<compile_context>
chip_gen: v7x
topology: tpu7x:2x2x1
jax: 0.10.0
libtpu: 0.0.40
codegen_flags: <defaults>
</compile_context>

<pallas_src>
import jax
import jax.numpy as jnp
from jax.experimental import pallas as pl
from jax.experimental.pallas import tpu as pltpu


def _make_lstm_kernel(batch, hidden, chunk_steps, n_chunks):
    B, H = batch, hidden
    CR = chunk_steps * B          # rows per projection sub-chunk

    def lstm_kernel(x_ref, wx_ref, wh_ref, b_ref,
                    hidden_ref, h_out_ref, c_out_ref, xw_sc):
        # x_ref      : (TC*B, D)   current time block, rows grouped per step
        # wx_ref     : (D, 4H)     input projection weights (VMEM resident)
        # wh_ref     : (H, 4H)     recurrent weights (VMEM resident)
        # b_ref      : (1, 4H)     fused bias
        # hidden_ref : (TC*B, H)   hidden_out rows for this time block
        # h_out_ref  : (B, H)      final h; also the carry across grid steps
        # c_out_ref  : (B, H)      final c; also the carry across grid steps
        # xw_sc      : (n_slots*CR, 4H) scratch: per-chunk x @ W_x + b (scaled)
        step = pl.program_id(0)

        # Zero the recurrent state once; the constant-index output blocks stay
        # VMEM-resident across grid steps, so they double as the carry.
        @pl.when(step == 0)
        def _():
            h_out_ref[...] = jnp.zeros_like(h_out_ref)
            c_out_ref[...] = jnp.zeros_like(c_out_ref)

        wx = wx_ref[...]
        wh = wh_ref[...]
        bias = b_ref[...]

        # Hoisted per-lane constants for the single-sigmoid gate trick:
        #   tanh(x) = 2*sigmoid(2x) - 1 on the candidate-cell (g) lanes.
        lane_r = jax.lax.broadcasted_iota(jnp.int32, (1, 4 * H), 1)
        is_g_r = (lane_r >= 2 * H) & (lane_r < 3 * H)
        pre_row = jnp.where(is_g_r, 2.0, 1.0)                 # (1, 4H) f32
        lane = jax.lax.broadcasted_iota(jnp.int32, (B, 4 * H), 1)
        is_g = (lane >= 2 * H) & (lane < 3 * H)
        post_mul = jnp.where(is_g, 2.0, 1.0)                  # (B, 4H)
        post_add = jnp.where(is_g, -1.0, 0.0)                 # (B, 4H)

        # Fold the g-lane pre-scale into the recurrent weights once per grid
        # step so the serial loop has no extra per-step multiply.
        whs = wh * pre_row.astype(wh.dtype)

        def project(j):
            # Input projection of sub-chunk j (bias + g-lane pre-scale folded
            # in) into xw_sc slot j % 2.  Pure MXU throughput work, off the
            # serial critical path.
            slot = j % 2
            dst = pl.multiple_of(slot * CR, CR)
            src = pl.multiple_of(j * CR, CR)
            xw_sc[pl.ds(dst, CR), :] = (
                jnp.dot(x_ref[pl.ds(src, CR), :], wx,
                        preferred_element_type=jnp.float32) + bias) * pre_row

        project(0)                 # prime chunk 0

        def chunk_body(j, carry):
            h, c = carry

            if n_chunks > 1:
                # Prefetch the next chunk's projection: it has no dependence
                # on this chunk's recurrence, so the MXU work hides under the
                # EUP/VPU-latency-bound serial loop below.
                @pl.when(j + 1 < n_chunks)
                def _():
                    project(j + 1)

            base = (j % 2) * CR    # xw_sc slot row offset for this chunk
            out_base = j * CR      # hidden_ref row offset for this chunk

            def step_body(t, hc):
                h, c = hc
                sr = pl.multiple_of(base + t * B, B)
                orow = pl.multiple_of(out_base + t * B, B)
                # Serial critical path: one matmul, one add, ONE sigmoid,
                # one FMA, then the gate combine.
                z = jnp.dot(h.astype(whs.dtype), whs,
                            preferred_element_type=jnp.float32)
                z = z + xw_sc[pl.ds(sr, B), :]
                act = jax.nn.sigmoid(z) * post_mul + post_add
                ft = act[:, 0 * H:1 * H]          # forget gate (sigmoid)
                it = act[:, 1 * H:2 * H]          # input gate  (sigmoid)
                gt = act[:, 2 * H:3 * H]          # candidate   (tanh via trick)
                ot = act[:, 3 * H:4 * H]          # output gate (sigmoid)
                c = c * ft + gt * it              # state math stays f32
                h = ot * jnp.tanh(c)
                hidden_ref[pl.ds(orow, B), :] = h
                return h, c

            # Bounded unroll: only over one projection chunk.
            return jax.lax.fori_loop(0, chunk_steps, step_body, (h, c),
                                     unroll=True)

        h, c = jax.lax.fori_loop(0, n_chunks, chunk_body,
                                 (h_out_ref[...], c_out_ref[...]))

        # Write the carry / final state once per grid step.
        h_out_ref[...] = h
        c_out_ref[...] = c

    return lstm_kernel


def my_lstm_forward(x, wx, wh, b, *, time_block=None, proj_chunk=4,
                    matmul_dtype=jnp.bfloat16, single_buffer_weights=True):
    """x: (T,B,D) f32, wx: (D,4H), wh: (H,4H), b: (1,4H).  Returns
    (hidden_out (T,B,H), final h (B,H), final c (B,H)), all f32."""
    T, B, D = x.shape
    H = wh.shape[0]
    assert wx.shape == (D, 4 * H) and wh.shape == (H, 4 * H)
    assert b.shape == (1, 4 * H)

    # ---- VMEM-derived sizing (v7x: 64 MiB; v5e/v6e: 128 MiB) ---------------
    try:
        vmem_bytes = int(pltpu.get_tpu_info().vmem_capacity_bytes)
    except Exception:
        vmem_bytes = 64 * 1024 * 1024        # conservative (v7x-sized) fallback
    vmem_budget = int(vmem_bytes * 0.75)

    in_b = jnp.dtype(matmul_dtype).itemsize
    chunk_guess = max(1, min(proj_chunk, T))
    fixed_bytes = (2 * ((D + H) * 4 * H * in_b + 4 * H * 4)    # weights + bias
                   + 2 * chunk_guess * B * 4 * H * 4)          # xw scratch slots
    per_step_bytes = B * (2 * D * in_b + 2 * H * 4)            # x + hidden blocks

    if time_block is None:
        tc_cap = max(1, (vmem_budget - fixed_bytes) // per_step_bytes)
        TC = int(min(T, tc_cap))
        while T % TC:
            TC -= 1
    else:
        TC = time_block
        assert T % TC == 0
    n_blocks = T // TC

    chunk = max(1, min(proj_chunk, TC))
    while TC % chunk:
        chunk -= 1
    n_chunks = TC // chunk
    n_slots = 2 if n_chunks > 1 else 1

    # bf16 matmul operands by default on ALL generations (MXU is bf16-native
    # even on v5e: fewer vmatmul passes, half the weight/x DMA bytes).  Bias,
    # activations, accumulation and the h/c state stay f32.
    x2 = x.reshape(T * B, D).astype(matmul_dtype)   # wrapper reshape: free
    wx2 = wx.astype(matmul_dtype)
    wh2 = wh.astype(matmul_dtype)
    b2 = b.astype(jnp.float32)

    kernel = _make_lstm_kernel(B, H, chunk, n_chunks)

    def build(resident_pipeline_mode):
        res_kw = ({} if resident_pipeline_mode is None
                  else dict(pipeline_mode=resident_pipeline_mode))
        grid_spec = pltpu.PrefetchScalarGridSpec(
            num_scalar_prefetch=0,
            grid=(n_blocks,),
            in_specs=[
                pl.BlockSpec((TC * B, D), lambda s: (s, 0)),           # x block
                pl.BlockSpec((D, 4 * H), lambda s: (0, 0), **res_kw),  # W_x
                pl.BlockSpec((H, 4 * H), lambda s: (0, 0), **res_kw),  # W_h
                pl.BlockSpec((1, 4 * H), lambda s: (0, 0), **res_kw),  # bias
            ],
            out_specs=[
                pl.BlockSpec((TC * B, H), lambda s: (s, 0)),   # hidden_out blk
                pl.BlockSpec((B, H), lambda s: (0, 0)),        # final h (carry)
                pl.BlockSpec((B, H), lambda s: (0, 0)),        # final c (carry)
            ],
            scratch_shapes=[
                pltpu.VMEM((n_slots * chunk * B, 4 * H), jnp.float32),
            ],
        )
        return pl.pallas_call(
            kernel,
            out_shape=(
                jax.ShapeDtypeStruct((T * B, H), jnp.float32),
                jax.ShapeDtypeStruct((B, H), jnp.float32),
                jax.ShapeDtypeStruct((B, H), jnp.float32),
            ),
            grid_spec=grid_spec,
            compiler_params=pltpu.CompilerParams(
                dimension_semantics=("arbitrary",),   # time recurrence serial
                vmem_limit_bytes=vmem_budget,
            ),
        )

    if single_buffer_weights:
        # Single-buffer the constant-index weight/bias blocks (they are
        # fetched once); matters for large H on v7x's 64 MiB VMEM.  Fall back
        # to default buffering if the installed jax rejects Buffered(1) here.
        try:
            out = build(pl.Buffered(1))(x2, wx2, wh2, b2)
        except Exception:
            out = build(None)(x2, wx2, wh2, b2)
    else:
        out = build(None)(x2, wx2, wh2, b2)

    hidden_flat, h_final, c_final = out
    return hidden_flat.reshape(T, B, H), h_final, c_final


def reference_lstm(x, wx, wh, b):
    """Pure-JAX reference for correctness checking."""
    T, B, D = x.shape
    H = wh.shape[0]
    h = jnp.zeros((B, H), jnp.float32)
    c = jnp.zeros((B, H), jnp.float32)
    outs = []
    for t in range(T):
        z = h @ wh + x[t] @ wx + b
        ft = jax.nn.sigmoid(z[:, 0 * H:1 * H])
        it = jax.nn.sigmoid(z[:, 1 * H:2 * H])
        gt = jnp.tanh(z[:, 2 * H:3 * H])
        ot = jax.nn.sigmoid(z[:, 3 * H:4 * H])
        c = c * ft + gt * it
        h = ot * jnp.tanh(c)
        outs.append(h)
    return jnp.stack(outs, 0), h, c


if __name__ == "__main__":
    # Small, deterministic setup: seq=8, batch=8, input_dim=32, hidden_dim=32.
    T, B, D, H = 8, 8, 32, 32

    key = jax.random.PRNGKey(0)
    kx, kf, ki, kg, ko, kb = jax.random.split(key, 6)

    x = jax.random.normal(kx, (T, B, D), dtype=jnp.float32)

    # Four Linear(input_dim + hidden_dim, hidden_dim) layers: split each into
    # recurrent (H, H) and input (D, H) halves (concat order [h, x]), stack
    # per gate -> W_h (H, 4H), W_x (D, 4H), gate order [f, i, g, o].
    scale = 1.0 / jnp.sqrt(jnp.float32(H + D))

    def make_gate(k):
        w = jax.random.normal(k, (H + D, H), dtype=jnp.float32) * scale
        return w[:H], w[H:]

    whf, wxf = make_gate(kf)
    whi, wxi = make_gate(ki)
    whg, wxg = make_gate(kg)
    who, wxo = make_gate(ko)
    wh = jnp.concatenate([whf, whi, whg, who], axis=1)   # (H, 4H)
    wx = jnp.concatenate([wxf, wxi, wxg, wxo], axis=1)   # (D, 4H)
    b = jax.random.normal(kb, (1, 4 * H), dtype=jnp.float32) * scale

    ref_hidden, ref_h, ref_c = reference_lstm(x, wx, wh, b)

    # 1) f32 matmul operands, auto time block; default proj_chunk=4 gives two
    #    projection chunks -> exercises the projection/recurrence overlap.
    h1o, h1, c1 = my_lstm_forward(x, wx, wh, b, matmul_dtype=jnp.float32)
    jax.block_until_ready((h1o, h1, c1))
    assert jnp.allclose(h1o, ref_hidden, atol=1e-4, rtol=1e-4)
    assert jnp.allclose(h1, ref_h, atol=1e-4, rtol=1e-4)
    assert jnp.allclose(c1, ref_c, atol=1e-4, rtol=1e-4)

    # 2) f32, explicit time-blocked grid (resident-output h/c carry across
    #    grid steps) with a smaller projection chunk.
    h2o, h2, c2 = my_lstm_forward(x, wx, wh, b, matmul_dtype=jnp.float32,
                                  time_block=T // 2, proj_chunk=2)
    jax.block_until_ready((h2o, h2, c2))
    assert jnp.allclose(h2o, ref_hidden, atol=1e-4, rtol=1e-4)
    assert jnp.allclose(h2, ref_h, atol=1e-4, rtol=1e-4)
    assert jnp.allclose(c2, ref_c, atol=1e-4, rtol=1e-4)

    # 3) Default path: bf16 matmul operands (MXU-native on v5e/v6e/v7x).
    #    h is re-cast to bf16 each step before h @ W_h so error compounds
    #    with T; loose tolerance, and the final h IS checked now.
    h3o, h3, c3 = my_lstm_forward(x, wx, wh, b)
    jax.block_until_ready((h3o, h3, c3))
    assert jnp.allclose(h3o, ref_hidden, atol=5e-2, rtol=5e-2)
    assert jnp.allclose(h3, ref_h, atol=5e-2, rtol=5e-2)
    assert jnp.allclose(c3, ref_c, atol=5e-2, rtol=5e-2)

    print("KERNEL_OK")
</pallas_src>

<mosaic_0001>
module attributes {stable_mosaic.version = 11 : i64} {
  func.func @lstm_kernel(%arg0: i32, %arg1: memref<64x32xf32, #tpu.memory_space<vmem>>, %arg2: memref<32x128xf32, #tpu.memory_space<vmem>>, %arg3: memref<32x128xf32, #tpu.memory_space<vmem>>, %arg4: memref<1x128xf32, #tpu.memory_space<vmem>>, %arg5: memref<64x32xf32, #tpu.memory_space<vmem>>, %arg6: memref<8x32xf32, #tpu.memory_space<vmem>>, %arg7: memref<8x32xf32, #tpu.memory_space<vmem>>, %arg8: memref<64x128xf32, #tpu.memory_space<vmem>>) attributes {dimension_semantics = [#tpu.dimension_semantics<arbitrary>], iteration_bounds = array<i64: 1>, scalar_prefetch = 0 : i64, scratch_operands = 1 : i64, tpu.core_type = #tpu.core_type<tc>, window_params = [{transform_indices = @transform_0, window_bounds = array<i64: 64, 32>}, {pipeline_mode = #tpu.pipeline_mode<synchronous>, transform_indices = @transform_1, window_bounds = array<i64: 32, 128>}, {pipeline_mode = #tpu.pipeline_mode<synchronous>, transform_indices = @transform_2, window_bounds = array<i64: 32, 128>}, {pipeline_mode = #tpu.pipeline_mode<synchronous>, transform_indices = @transform_3, window_bounds = array<i64: 1, 128>}, {transform_indices = @transform_4, window_bounds = array<i64: 64, 32>}, {pipeline_mode = #tpu.pipeline_mode<synchronous>, transform_indices = @transform_5, window_bounds = array<i64: 8, 32>}, {pipeline_mode = #tpu.pipeline_mode<synchronous>, transform_indices = @transform_6, window_bounds = array<i64: 8, 32>}]} {
    %c0_i32 = arith.constant 0 : i32
    %0 = arith.cmpi eq, %arg0, %c0_i32 : i32
    %1 = arith.extui %0 : i1 to i32
    %c0_i32_0 = arith.constant 0 : i32
    %2 = arith.cmpi ne, %1, %c0_i32_0 : i32
    scf.if %2 {
      %cst_28 = arith.constant 0.000000e+00 : f32
      %46 = vector.broadcast %cst_28 : f32 to vector<8x32xf32>
      %c0_29 = arith.constant 0 : index
      %c0_30 = arith.constant 0 : index
      %47 = vector.load %arg6[%c0_29, %c0_30] : memref<8x32xf32, #tpu.memory_space<vmem>>, vector<8x32xf32>
      tpu.vector_store %arg6[%c0_29, %c0_30], %46 {strides = array<i32>} : memref<8x32xf32, #tpu.memory_space<vmem>>, vector<8x32xf32>,
      %cst_31 = arith.constant 0.000000e+00 : f32
      %48 = vector.broadcast %cst_31 : f32 to vector<8x32xf32>
      %c0_32 = arith.constant 0 : index
      %c0_33 = arith.constant 0 : index
      %49 = vector.load %arg7[%c0_32, %c0_33] : memref<8x32xf32, #tpu.memory_space<vmem>>, vector<8x32xf32>
      tpu.vector_store %arg7[%c0_32, %c0_33], %48 {strides = array<i32>} : memref<8x32xf32, #tpu.memory_space<vmem>>, vector<8x32xf32>,
    } else {
    }
    %c0 = arith.constant 0 : index
    %c0_1 = arith.constant 0 : index
    %3 = vector.load %arg2[%c0, %c0_1] : memref<32x128xf32, #tpu.memory_space<vmem>>, vector<32x128xf32>
    %c0_2 = arith.constant 0 : index
    %c0_3 = arith.constant 0 : index
    %4 = vector.load %arg3[%c0_2, %c0_3] : memref<32x128xf32, #tpu.memory_space<vmem>>, vector<32x128xf32>
    %c0_4 = arith.constant 0 : index
    %c0_5 = arith.constant 0 : index
    %5 = vector.load %arg4[%c0_4, %c0_5] : memref<1x128xf32, #tpu.memory_space<vmem>>, vector<1x128xf32>
    %6 = tpu.iota {dimensions = array<i32: 1>} : vector<1x128xi32>
    %c64_i32 = arith.constant 64 : i32
    %7 = vector.broadcast %c64_i32 : i32 to vector<1x128xi32>
    %8 = arith.cmpi sge, %6, %7 : vector<1x128xi32>
    %c96_i32 = arith.constant 96 : i32
    %9 = vector.broadcast %c96_i32 : i32 to vector<1x128xi32>
    %10 = arith.cmpi slt, %6, %9 : vector<1x128xi32>
    %11 = arith.andi %8, %10 : vector<1x128xi1>
    %cst = arith.constant 2.000000e+00 : f32
    %cst_6 = arith.constant 1.000000e+00 : f32
    %12 = vector.broadcast %cst : f32 to vector<1x128xf32>
    %13 = vector.broadcast %cst_6 : f32 to vector<1x128xf32>
    %14 = arith.select %11, %12, %13 : vector<1x128xi1>, vector<1x128xf32>
    %15 = tpu.iota {dimensions = array<i32: 1>} : vector<8x128xi32>
    %c64_i32_7 = arith.constant 64 : i32
    %16 = vector.broadcast %c64_i32_7 : i32 to vector<8x128xi32>
    %17 = arith.cmpi sge, %15, %16 : vector<8x128xi32>
    %c96_i32_8 = arith.constant 96 : i32
    %18 = vector.broadcast %c96_i32_8 : i32 to vector<8x128xi32>
    %19 = arith.cmpi slt, %15, %18 : vector<8x128xi32>
    %20 = arith.andi %17, %19 : vector<8x128xi1>
    %cst_9 = arith.constant 2.000000e+00 : f32
    %cst_10 = arith.constant 1.000000e+00 : f32
    %21 = vector.broadcast %cst_9 : f32 to vector<8x128xf32>
    %22 = vector.broadcast %cst_10 : f32 to vector<8x128xf32>
    %23 = arith.select %20, %21, %22 : vector<8x128xi1>, vector<8x128xf32>
    %cst_11 = arith.constant -1.000000e+00 : f32
    %cst_12 = arith.constant 0.000000e+00 : f32
    %24 = vector.broadcast %cst_11 : f32 to vector<8x128xf32>
    %25 = vector.broadcast %cst_12 : f32 to vector<8x128xf32>
    %26 = arith.select %20, %24, %25 : vector<8x128xi1>, vector<8x128xf32>
    %27 = vector.broadcast %14 : vector<1x128xf32> to vector<32x128xf32>
    %28 = arith.mulf %4, %27 : vector<32x128xf32>
    %c0_i32_13 = arith.constant 0 : i32
    %29 = tpu.assume_multiple %c0_i32_13, 32 : i32
    %c0_i32_14 = arith.constant 0 : i32
    %30 = tpu.assume_multiple %c0_i32_14, 32 : i32
    %31 = arith.index_cast %30 : i32 to index
    %c0_15 = arith.constant 0 : index
    %32 = vector.load %arg1[%31, %c0_15] : memref<64x32xf32, #tpu.memory_space<vmem>>, vector<32x32xf32>
    %cst_16 = arith.constant dense<0.000000e+00> : vector<32x128xf32>
    %33 = tpu.matmul %32, %3, %cst_16 {dimension_numbers = #tpu.dot_dimension_numbers<[1], [0], [0], [1], [0, 0, 1, 1], [], []>} : vector<32x32xf32>, vector<32x128xf32>, vector<32x128xf32> -> vector<32x128xf32>
    %34 = vector.broadcast %5 : vector<1x128xf32> to vector<32x128xf32>
    %35 = arith.addf %33, %34 : vector<32x128xf32>
    %36 = vector.broadcast %14 : vector<1x128xf32> to vector<32x128xf32>
    %37 = arith.mulf %35, %36 : vector<32x128xf32>
    %38 = arith.index_cast %29 : i32 to index
    %c0_17 = arith.constant 0 : index
    %39 = vector.load %arg8[%38, %c0_17] : memref<64x128xf32, #tpu.memory_space<vmem>>, vector<32x128xf32>
    tpu.vector_store %arg8[%38, %c0_17], %37 {strides = array<i32>} : memref<64x128xf32, #tpu.memory_space<vmem>>, vector<32x128xf32>,
    %c0_18 = arith.constant 0 : index
    %c0_19 = arith.constant 0 : index
    %40 = vector.load %arg6[%c0_18, %c0_19] : memref<8x32xf32, #tpu.memory_space<vmem>>, vector<8x32xf32>
    %c0_20 = arith.constant 0 : index
    %c0_21 = arith.constant 0 : index
    %41 = vector.load %arg7[%c0_20, %c0_21] : memref<8x32xf32, #tpu.memory_space<vmem>>, vector<8x32xf32>
    %c0_i32_22 = arith.constant 0 : i32
    %c2_i32 = arith.constant 2 : i32
    %42 = arith.addi %c0_i32_22, %c2_i32 : i32
    %c1_i32 = arith.constant 1 : i32
    %43:2 = scf.for %arg9 = %c0_i32_22 to %42 step %c1_i32 iter_args(%arg10 = %40, %arg11 = %41) -> (vector<8x32xf32>, vector<8x32xf32>)  : i32 {
      %c1_i32_28 = arith.constant 1 : i32
      %46 = arith.addi %arg9, %c1_i32_28 : i32
      %c2_i32_29 = arith.constant 2 : i32
      %47 = arith.cmpi slt, %46, %c2_i32_29 : i32
      %48 = arith.extui %47 : i1 to i32
      %c0_i32_30 = arith.constant 0 : i32
      %49 = arith.cmpi ne, %48, %c0_i32_30 : i32
      scf.if %49 {
        %c1_i32_64 = arith.constant 1 : i32
        %174 = arith.addi %arg9, %c1_i32_64 : i32
        %c2_i32_65 = arith.constant 2 : i32
        %c0_i32_66 = arith.constant 0 : i32
        %175 = arith.cmpi eq, %c2_i32_65, %c0_i32_66 : i32
        %c1_i32_67 = arith.constant 1 : i32
        %176 = arith.select %175, %c1_i32_67, %c2_i32_65 : i32
        %177 = arith.remsi %174, %176 : i32
        %c0_i32_68 = arith.constant 0 : i32
        %178 = arith.cmpi ne, %177, %c0_i32_68 : i32
        %c0_i32_69 = arith.constant 0 : i32
        %179 = arith.cmpi slt, %177, %c0_i32_69 : i32
        %c0_i32_70 = arith.constant 0 : i32
        %180 = arith.cmpi slt, %176, %c0_i32_70 : i32
        %181 = arith.xori %179, %180 : i1
        %182 = arith.andi %181, %178 : i1
        %183 = arith.addi %177, %176 : i32
        %184 = arith.select %182, %183, %177 : i32
        %c32_i32_71 = arith.constant 32 : i32
        %185 = arith.muli %184, %c32_i32_71 : i32
        %186 = tpu.assume_multiple %185, 32 : i32
        %c32_i32_72 = arith.constant 32 : i32
        %187 = arith.muli %174, %c32_i32_72 : i32
        %188 = tpu.assume_multiple %187, 32 : i32
        %189 = arith.index_cast %188 : i32 to index
        %c0_73 = arith.constant 0 : index
        %190 = vector.load %arg1[%189, %c0_73] : memref<64x32xf32, #tpu.memory_space<vmem>>, vector<32x32xf32>
        %cst_74 = arith.constant dense<0.000000e+00> : vector<32x128xf32>
        %191 = tpu.matmul %190, %3, %cst_74 {dimension_numbers = #tpu.dot_dimension_numbers<[1], [0], [0], [1], [0, 0, 1, 1], [], []>} : vector<32x32xf32>, vector<32x128xf32>, vector<32x128xf32> -> vector<32x128xf32>
        %192 = vector.broadcast %5 : vector<1x128xf32> to vector<32x128xf32>
        %193 = arith.addf %191, %192 : vector<32x128xf32>
        %194 = vector.broadcast %14 : vector<1x128xf32> to vector<32x128xf32>
        %195 = arith.mulf %193, %194 : vector<32x128xf32>
        %196 = arith.index_cast %186 : i32 to index
        %c0_75 = arith.constant 0 : index
        %197 = vector.load %arg8[%196, %c0_75] : memref<64x128xf32, #tpu.memory_space<vmem>>, vector<32x128xf32>
        tpu.vector_store %arg8[%196, %c0_75], %195 {strides = array<i32>} : memref<64x128xf32, #tpu.memory_space<vmem>>, vector<32x128xf32>,
      } else {
      }
      %c2_i32_31 = arith.constant 2 : i32
      %c0_i32_32 = arith.constant 0 : i32
      %50 = arith.cmpi eq, %c2_i32_31, %c0_i32_32 : i32
      %c1_i32_33 = arith.constant 1 : i32
      %51 = arith.select %50, %c1_i32_33, %c2_i32_31 : i32
      %52 = arith.remsi %arg9, %51 : i32
      %c0_i32_34 = arith.constant 0 : i32
      %53 = arith.cmpi ne, %52, %c0_i32_34 : i32
      %c0_i32_35 = arith.constant 0 : i32
      %54 = arith.cmpi slt, %52, %c0_i32_35 : i32
      %c0_i32_36 = arith.constant 0 : i32
      %55 = arith.cmpi slt, %51, %c0_i32_36 : i32
      %56 = arith.xori %54, %55 : i1
      %57 = arith.andi %56, %53 : i1
      %58 = arith.addi %52, %51 : i32
      %59 = arith.select %57, %58, %52 : i32
      %c32_i32 = arith.constant 32 : i32
      %60 = arith.muli %59, %c32_i32 : i32
      %c32_i32_37 = arith.constant 32 : i32
      %61 = arith.muli %arg9, %c32_i32_37 : i32
      %c0_i32_38 = arith.constant 0 : i32
      %c8_i32 = arith.constant 8 : i32
      %62 = arith.muli %c0_i32_38, %c8_i32 : i32
      %63 = arith.addi %60, %62 : i32
      %64 = tpu.assume_multiple %63, 8 : i32
      %c8_i32_39 = arith.constant 8 : i32
      %65 = arith.muli %c0_i32_38, %c8_i32_39 : i32
      %66 = arith.addi %61, %65 : i32
      %67 = tpu.assume_multiple %66, 8 : i32
      %cst_40 = arith.constant dense<0.000000e+00> : vector<8x128xf32>
      %68 = tpu.matmul %arg10, %28, %cst_40 {dimension_numbers = #tpu.dot_dimension_numbers<[1], [0], [0], [1], [0, 0, 1, 1], [], []>} : vector<8x32xf32>, vector<32x128xf32>, vector<8x128xf32> -> vector<8x128xf32>
      %69 = arith.index_cast %64 : i32 to index
      %c0_41 = arith.constant 0 : index
      %70 = vector.load %arg8[%69, %c0_41] : memref<64x128xf32, #tpu.memory_space<vmem>>, vector<8x128xf32>
      %71 = arith.addf %68, %70 : vector<8x128xf32>
      %72 = arith.negf %71 : vector<8x128xf32>
      %73 = math.exp %72 : vector<8x128xf32>
      %cst_42 = arith.constant 1.000000e+00 : f32
      %74 = vector.broadcast %cst_42 : f32 to vector<8x128xf32>
      %75 = arith.addf %74, %73 : vector<8x128xf32>
      %76 = arith.divf %74, %75 : vector<8x128xf32>
      %77 = arith.mulf %76, %23 : vector<8x128xf32>
      %78 = arith.addf %77, %26 : vector<8x128xf32>
      %79 = vector.extract_strided_slice %78 {offsets = [0, 0], sizes = [8, 32], strides = [1, 1]} : vector<8x128xf32> to vector<8x32xf32>
      %80 = vector.extract_strided_slice %78 {offsets = [0, 32], sizes = [8, 32], strides = [1, 1]} : vector<8x128xf32> to vector<8x32xf32>
      %81 = vector.extract_strided_slice %78 {offsets = [0, 64], sizes = [8, 32], strides = [1, 1]} : vector<8x128xf32> to vector<8x32xf32>
      %82 = vector.extract_strided_slice %78 {offsets = [0, 96], sizes = [8, 32], strides = [1, 1]} : vector<8x128xf32> to vector<8x32xf32>
      %83 = arith.mulf %arg11, %79 : vector<8x32xf32>
      %84 = arith.mulf %81, %80 : vector<8x32xf32>
      %85 = arith.addf %83, %84 : vector<8x32xf32>
      %86 = math.tanh %85 : vector<8x32xf32>
      %87 = arith.mulf %82, %86 : vector<8x32xf32>
      %88 = arith.index_cast %67 : i32 to index
      %c0_43 = arith.constant 0 : index
      %89 = vector.load %arg5[%88, %c0_43] : memref<64x32xf32, #tpu.memory_space<vmem>>, vector<8x32xf32>
      tpu.vector_store %arg5[%88, %c0_43], %87 {strides = array<i32>} : memref<64x32xf32, #tpu.memory_space<vmem>>, vector<8x32xf32>,
      %c1_i32_44 = arith.constant 1 : i32
      %c8_i32_45 = arith.constant 8 : i32
      %90 = arith.muli %c1_i32_44, %c8_i32_45 : i32
      %91 = arith.addi %60, %90 : i32
      %92 = tpu.assume_multiple %91, 8 : i32
      %c8_i32_46 = arith.constant 8 : i32
      %93 = arith.muli %c1_i32_44, %c8_i32_46 : i32
      %94 = arith.addi %61, %93 : i32
      %95 = tpu.assume_multiple %94, 8 : i32
      %cst_47 = arith.constant dense<0.000000e+00> : vector<8x128xf32>
      %96 = tpu.matmul %87, %28, %cst_47 {dimension_numbers = #tpu.dot_dimension_numbers<[1], [0], [0], [1], [0, 0, 1, 1], [], []>} : vector<8x32xf32>, vector<32x128xf32>, vector<8x128xf32> -> vector<8x128xf32>
      %97 = arith.index_cast %92 : i32 to index
      %c0_48 = arith.constant 0 : index
      %98 = vector.load %arg8[%97, %c0_48] : memref<64x128xf32, #tpu.memory_space<vmem>>, vector<8x128xf32>
      %99 = arith.addf %96, %98 : vector<8x128xf32>
      %100 = arith.negf %99 : vector<8x128xf32>
      %101 = math.exp %100 : vector<8x128xf32>
      %cst_49 = arith.constant 1.000000e+00 : f32
      %102 = vector.broadcast %cst_49 : f32 to vector<8x128xf32>
      %103 = arith.addf %102, %101 : vector<8x128xf32>
      %104 = arith.divf %102, %103 : vector<8x128xf32>
      %105 = arith.mulf %104, %23 : vector<8x128xf32>
      %106 = arith.addf %105, %26 : vector<8x128xf32>
      %107 = vector.extract_strided_slice %106 {offsets = [0, 0], sizes = [8, 32], strides = [1, 1]} : vector<8x128xf32> to vector<8x32xf32>
      %108 = vector.extract_strided_slice %106 {offsets = [0, 32], sizes = [8, 32], strides = [1, 1]} : vector<8x128xf32> to vector<8x32xf32>
      %109 = vector.extract_strided_slice %106 {offsets = [0, 64], sizes = [8, 32], strides = [1, 1]} : vector<8x128xf32> to vector<8x32xf32>
      %110 = vector.extract_strided_slice %106 {offsets = [0, 96], sizes = [8, 32], strides = [1, 1]} : vector<8x128xf32> to vector<8x32xf32>
      %111 = arith.mulf %85, %107 : vector<8x32xf32>
      %112 = arith.mulf %109, %108 : vector<8x32xf32>
      %113 = arith.addf %111, %112 : vector<8x32xf32>
      %114 = math.tanh %113 : vector<8x32xf32>
      %115 = arith.mulf %110, %114 : vector<8x32xf32>
      %116 = arith.index_cast %95 : i32 to index
      %c0_50 = arith.constant 0 : index
      %117 = vector.load %arg5[%116, %c0_50] : memref<64x32xf32, #tpu.memory_space<vmem>>, vector<8x32xf32>
      tpu.vector_store %arg5[%116, %c0_50], %115 {strides = array<i32>} : memref<64x32xf32, #tpu.memory_space<vmem>>, vector<8x32xf32>,
      %c2_i32_51 = arith.constant 2 : i32
      %c8_i32_52 = arith.constant 8 : i32
      %118 = arith.muli %c2_i32_51, %c8_i32_52 : i32
      %119 = arith.addi %60, %118 : i32
      %120 = tpu.assume_multiple %119, 8 : i32
      %c8_i32_53 = arith.constant 8 : i32
      %121 = arith.muli %c2_i32_51, %c8_i32_53 : i32
      %122 = arith.addi %61, %121 : i32
      %123 = tpu.assume_multiple %122, 8 : i32
      %cst_54 = arith.constant dense<0.000000e+00> : vector<8x128xf32>
      %124 = tpu.matmul %115, %28, %cst_54 {dimension_numbers = #tpu.dot_dimension_numbers<[1], [0], [0], [1], [0, 0, 1, 1], [], []>} : vector<8x32xf32>, vector<32x128xf32>, vector<8x128xf32> -> vector<8x128xf32>
      %125 = arith.index_cast %120 : i32 to index
      %c0_55 = arith.constant 0 : index
      %126 = vector.load %arg8[%125, %c0_55] : memref<64x128xf32, #tpu.memory_space<vmem>>, vector<8x128xf32>
      %127 = arith.addf %124, %126 : vector<8x128xf32>
      %128 = arith.negf %127 : vector<8x128xf32>
      %129 = math.exp %128 : vector<8x128xf32>
      %cst_56 = arith.constant 1.000000e+00 : f32
      %130 = vector.broadcast %cst_56 : f32 to vector<8x128xf32>
      %131 = arith.addf %130, %129 : vector<8x128xf32>
      %132 = arith.divf %130, %131 : vector<8x128xf32>
      %133 = arith.mulf %132, %23 : vector<8x128xf32>
      %134 = arith.addf %133, %26 : vector<8x128xf32>
      %135 = vector.extract_strided_slice %134 {offsets = [0, 0], sizes = [8, 32], strides = [1, 1]} : vector<8x128xf32> to vector<8x32xf32>
      %136 = vector.extract_strided_slice %134 {offsets = [0, 32], sizes = [8, 32], strides = [1, 1]} : vector<8x128xf32> to vector<8x32xf32>
      %137 = vector.extract_strided_slice %134 {offsets = [0, 64], sizes = [8, 32], strides = [1, 1]} : vector<8x128xf32> to vector<8x32xf32>
      %138 = vector.extract_strided_slice %134 {offsets = [0, 96], sizes = [8, 32], strides = [1, 1]} : vector<8x128xf32> to vector<8x32xf32>
      %139 = arith.mulf %113, %135 : vector<8x32xf32>
      %140 = arith.mulf %137, %136 : vector<8x32xf32>
      %141 = arith.addf %139, %140 : vector<8x32xf32>
      %142 = math.tanh %141 : vector<8x32xf32>
      %143 = arith.mulf %138, %142 : vector<8x32xf32>
      %144 = arith.index_cast %123 : i32 to index
      %c0_57 = arith.constant 0 : index
      %145 = vector.load %arg5[%144, %c0_57] : memref<64x32xf32, #tpu.memory_space<vmem>>, vector<8x32xf32>
      tpu.vector_store %arg5[%144, %c0_57], %143 {strides = array<i32>} : memref<64x32xf32, #tpu.memory_space<vmem>>, vector<8x32xf32>,
      %c3_i32 = arith.constant 3 : i32
      %c8_i32_58 = arith.constant 8 : i32
      %146 = arith.muli %c3_i32, %c8_i32_58 : i32
      %147 = arith.addi %60, %146 : i32
      %148 = tpu.assume_multiple %147, 8 : i32
      %c8_i32_59 = arith.constant 8 : i32
      %149 = arith.muli %c3_i32, %c8_i32_59 : i32
      %150 = arith.addi %61, %149 : i32
      %151 = tpu.assume_multiple %150, 8 : i32
      %cst_60 = arith.constant dense<0.000000e+00> : vector<8x128xf32>
      %152 = tpu.matmul %143, %28, %cst_60 {dimension_numbers = #tpu.dot_dimension_numbers<[1], [0], [0], [1], [0, 0, 1, 1], [], []>} : vector<8x32xf32>, vector<32x128xf32>, vector<8x128xf32> -> vector<8x128xf32>
      %153 = arith.index_cast %148 : i32 to index
      %c0_61 = arith.constant 0 : index
      %154 = vector.load %arg8[%153, %c0_61] : memref<64x128xf32, #tpu.memory_space<vmem>>, vector<8x128xf32>
      %155 = arith.addf %152, %154 : vector<8x128xf32>
      %156 = arith.negf %155 : vector<8x128xf32>
      %157 = math.exp %156 : vector<8x128xf32>
      %cst_62 = arith.constant 1.000000e+00 : f32
      %158 = vector.broadcast %cst_62 : f32 to vector<8x128xf32>
      %159 = arith.addf %158, %157 : vector<8x128xf32>
      %160 = arith.divf %158, %159 : vector<8x128xf32>
      %161 = arith.mulf %160, %23 : vector<8x128xf32>
      %162 = arith.addf %161, %26 : vector<8x128xf32>
      %163 = vector.extract_strided_slice %162 {offsets = [0, 0], sizes = [8, 32], strides = [1, 1]} : vector<8x128xf32> to vector<8x32xf32>
      %164 = vector.extract_strided_slice %162 {offsets = [0, 32], sizes = [8, 32], strides = [1, 1]} : vector<8x128xf32> to vector<8x32xf32>
      %165 = vector.extract_strided_slice %162 {offsets = [0, 64], sizes = [8, 32], strides = [1, 1]} : vector<8x128xf32> to vector<8x32xf32>
      %166 = vector.extract_strided_slice %162 {offsets = [0, 96], sizes = [8, 32], strides = [1, 1]} : vector<8x128xf32> to vector<8x32xf32>
      %167 = arith.mulf %141, %163 : vector<8x32xf32>
      %168 = arith.mulf %165, %164 : vector<8x32xf32>
      %169 = arith.addf %167, %168 : vector<8x32xf32>
      %170 = math.tanh %169 : vector<8x32xf32>
      %171 = arith.mulf %166, %170 : vector<8x32xf32>
      %172 = arith.index_cast %151 : i32 to index
      %c0_63 = arith.constant 0 : index
      %173 = vector.load %arg5[%172, %c0_63] : memref<64x32xf32, #tpu.memory_space<vmem>>, vector<8x32xf32>
      tpu.vector_store %arg5[%172, %c0_63], %171 {strides = array<i32>} : memref<64x32xf32, #tpu.memory_space<vmem>>, vector<8x32xf32>,
      %c4_i32 = arith.constant 4 : i32
      scf.yield %171, %169 : vector<8x32xf32>, vector<8x32xf32>
    }
    %c2_i32_23 = arith.constant 2 : i32
    %c0_24 = arith.constant 0 : index
    %c0_25 = arith.constant 0 : index
    %44 = vector.load %arg6[%c0_24, %c0_25] : memref<8x32xf32, #tpu.memory_space<vmem>>, vector<8x32xf32>
    tpu.vector_store %arg6[%c0_24, %c0_25], %43#0 {strides = array<i32>} : memref<8x32xf32, #tpu.memory_space<vmem>>, vector<8x32xf32>,
    %c0_26 = arith.constant 0 : index
    %c0_27 = arith.constant 0 : index
    %45 = vector.load %arg7[%c0_26, %c0_27] : memref<8x32xf32, #tpu.memory_space<vmem>>, vector<8x32xf32>
    tpu.vector_store %arg7[%c0_26, %c0_27], %43#1 {strides = array<i32>} : memref<8x32xf32, #tpu.memory_space<vmem>>, vector<8x32xf32>,
    return
  }
  func.func @transform_0(%arg0: i32) -> (i32, i32) {
    %c0_i32 = arith.constant 0 : i32
    %c0_i32_0 = arith.constant 0 : i32
    return %arg0, %c0_i32 : i32, i32
  }
  func.func @transform_1(%arg0: i32) -> (i32, i32) {
    %c0_i32 = arith.constant 0 : i32
    %c0_i32_0 = arith.constant 0 : i32
    %c0_i32_1 = arith.constant 0 : i32
    return %c0_i32, %c0_i32_0 : i32, i32
  }
  func.func @transform_2(%arg0: i32) -> (i32, i32) {
    %c0_i32 = arith.constant 0 : i32
    %c0_i32_0 = arith.constant 0 : i32
    %c0_i32_1 = arith.constant 0 : i32
    return %c0_i32, %c0_i32_0 : i32, i32
  }
  func.func @transform_3(%arg0: i32) -> (i32, i32) {
    %c0_i32 = arith.constant 0 : i32
    %c0_i32_0 = arith.constant 0 : i32
    %c0_i32_1 = arith.constant 0 : i32
    return %c0_i32, %c0_i32_0 : i32, i32
  }
  func.func @transform_4(%arg0: i32) -> (i32, i32) {
    %c0_i32 = arith.constant 0 : i32
    %c0_i32_0 = arith.constant 0 : i32
    return %arg0, %c0_i32 : i32, i32
  }
  func.func @transform_5(%arg0: i32) -> (i32, i32) {
    %c0_i32 = arith.constant 0 : i32
    %c0_i32_0 = arith.constant 0 : i32
    %c0_i32_1 = arith.constant 0 : i32
    return %c0_i32, %c0_i32_0 : i32, i32
  }
  func.func @transform_6(%arg0: i32) -> (i32, i32) {
    %c0_i32 = arith.constant 0 : i32
    %c0_i32_0 = arith.constant 0 : i32
    %c0_i32_1 = arith.constant 0 : i32
    return %c0_i32, %c0_i32_0 : i32, i32
  }
}

module attributes {stable_mosaic.version = 11 : i64} {
  func.func @lstm_kernel(%arg0: i32, %arg1: memref<64x32xf32, #tpu.memory_space<vmem>>, %arg2: memref<32x128xf32, #tpu.memory_space<vmem>>, %arg3: memref<32x128xf32, #tpu.memory_space<vmem>>, %arg4: memref<1x128xf32, #tpu.memory_space<vmem>>, %arg5: memref<64x32xf32, #tpu.memory_space<vmem>>, %arg6: memref<8x32xf32, #tpu.memory_space<vmem>>, %arg7: memref<8x32xf32, #tpu.memory_space<vmem>>, %arg8: memref<64x128xf32, #tpu.memory_space<vmem>>) attributes {dimension_semantics = [#tpu.dimension_semantics<arbitrary>], iteration_bounds = array<i64: 1>, scalar_prefetch = 0 : i64, scratch_operands = 1 : i64, tpu.core_type = #tpu.core_type<tc>, window_params = [{transform_indices = @transform_0, window_bounds = array<i64: 64, 32>}, {pipeline_mode = #tpu.pipeline_mode<synchronous>, transform_indices = @transform_1, window_bounds = array<i64: 32, 128>}, {pipeline_mode = #tpu.pipeline_mode<synchronous>, transform_indices = @transform_2, window_bounds = array<i64: 32, 128>}, {pipeline_mode = #tpu.pipeline_mode<synchronous>, transform_indices = @transform_3, window_bounds = array<i64: 1, 128>}, {transform_indices = @transform_4, window_bounds = array<i64: 64, 32>}, {pipeline_mode = #tpu.pipeline_mode<synchronous>, transform_indices = @transform_5, window_bounds = array<i64: 8, 32>}, {pipeline_mode = #tpu.pipeline_mode<synchronous>, transform_indices = @transform_6, window_bounds = array<i64: 8, 32>}]} {
    %c0_i32 = arith.constant 0 : i32
    %0 = arith.cmpi eq, %arg0, %c0_i32 : i32
    %1 = arith.extui %0 : i1 to i32
    %c0_i32_0 = arith.constant 0 : i32
    %2 = arith.cmpi ne, %1, %c0_i32_0 : i32
    scf.if %2 {
      %cst_28 = arith.constant 0.000000e+00 : f32
      %46 = vector.broadcast %cst_28 : f32 to vector<8x32xf32>
      %c0_29 = arith.constant 0 : index
      %c0_30 = arith.constant 0 : index
      %47 = vector.load %arg6[%c0_29, %c0_30] : memref<8x32xf32, #tpu.memory_space<vmem>>, vector<8x32xf32>
      tpu.vector_store %arg6[%c0_29, %c0_30], %46 {strides = array<i32>} : memref<8x32xf32, #tpu.memory_space<vmem>>, vector<8x32xf32>,
      %cst_31 = arith.constant 0.000000e+00 : f32
      %48 = vector.broadcast %cst_31 : f32 to vector<8x32xf32>
      %c0_32 = arith.constant 0 : index
      %c0_33 = arith.constant 0 : index
      %49 = vector.load %arg7[%c0_32, %c0_33] : memref<8x32xf32, #tpu.memory_space<vmem>>, vector<8x32xf32>
      tpu.vector_store %arg7[%c0_32, %c0_33], %48 {strides = array<i32>} : memref<8x32xf32, #tpu.memory_space<vmem>>, vector<8x32xf32>,
    } else {
    }
    %c0 = arith.constant 0 : index
    %c0_1 = arith.constant 0 : index
    %3 = vector.load %arg2[%c0, %c0_1] : memref<32x128xf32, #tpu.memory_space<vmem>>, vector<32x128xf32>
    %c0_2 = arith.constant 0 : index
    %c0_3 = arith.constant 0 : index
    %4 = vector.load %arg3[%c0_2, %c0_3] : memref<32x128xf32, #tpu.memory_space<vmem>>, vector<32x128xf32>
    %c0_4 = arith.constant 0 : index
    %c0_5 = arith.constant 0 : index
    %5 = vector.load %arg4[%c0_4, %c0_5] : memref<1x128xf32, #tpu.memory_space<vmem>>, vector<1x128xf32>
    %6 = tpu.iota {dimensions = array<i32: 1>} : vector<1x128xi32>
    %c64_i32 = arith.constant 64 : i32
    %7 = vector.broadcast %c64_i32 : i32 to vector<1x128xi32>
    %8 = arith.cmpi sge, %6, %7 : vector<1x128xi32>
    %c96_i32 = arith.constant 96 : i32
    %9 = vector.broadcast %c96_i32 : i32 to vector<1x128xi32>
    %10 = arith.cmpi slt, %6, %9 : vector<1x128xi32>
    %11 = arith.andi %8, %10 : vector<1x128xi1>
    %cst = arith.constant 2.000000e+00 : f32
    %cst_6 = arith.constant 1.000000e+00 : f32
    %12 = vector.broadcast %cst : f32 to vector<1x128xf32>
    %13 = vector.broadcast %cst_6 : f32 to vector<1x128xf32>
    %14 = arith.select %11, %12, %13 : vector<1x128xi1>, vector<1x128xf32>
    %15 = tpu.iota {dimensions = array<i32: 1>} : vector<8x128xi32>
    %c64_i32_7 = arith.constant 64 : i32
    %16 = vector.broadcast %c64_i32_7 : i32 to vector<8x128xi32>
    %17 = arith.cmpi sge, %15, %16 : vector<8x128xi32>
    %c96_i32_8 = arith.constant 96 : i32
    %18 = vector.broadcast %c96_i32_8 : i32 to vector<8x128xi32>
    %19 = arith.cmpi slt, %15, %18 : vector<8x128xi32>
    %20 = arith.andi %17, %19 : vector<8x128xi1>
    %cst_9 = arith.constant 2.000000e+00 : f32
    %cst_10 = arith.constant 1.000000e+00 : f32
    %21 = vector.broadcast %cst_9 : f32 to vector<8x128xf32>
    %22 = vector.broadcast %cst_10 : f32 to vector<8x128xf32>
    %23 = arith.select %20, %21, %22 : vector<8x128xi1>, vector<8x128xf32>
    %cst_11 = arith.constant -1.000000e+00 : f32
    %cst_12 = arith.constant 0.000000e+00 : f32
    %24 = vector.broadcast %cst_11 : f32 to vector<8x128xf32>
    %25 = vector.broadcast %cst_12 : f32 to vector<8x128xf32>
    %26 = arith.select %20, %24, %25 : vector<8x128xi1>, vector<8x128xf32>
    %27 = vector.broadcast %14 : vector<1x128xf32> to vector<32x128xf32>
    %28 = arith.mulf %4, %27 : vector<32x128xf32>
    %c0_i32_13 = arith.constant 0 : i32
    %29 = tpu.assume_multiple %c0_i32_13, 32 : i32
    %c0_i32_14 = arith.constant 0 : i32
    %30 = tpu.assume_multiple %c0_i32_14, 32 : i32
    %31 = arith.index_cast %30 : i32 to index
    %c0_15 = arith.constant 0 : index
    %32 = vector.load %arg1[%31, %c0_15] : memref<64x32xf32, #tpu.memory_space<vmem>>, vector<32x32xf32>
    %cst_16 = arith.constant dense<0.000000e+00> : vector<32x128xf32>
    %33 = tpu.matmul %32, %3, %cst_16 {dimension_numbers = #tpu.dot_dimension_numbers<[1], [0], [0], [1], [0, 0, 1, 1], [], []>} : vector<32x32xf32>, vector<32x128xf32>, vector<32x128xf32> -> vector<32x128xf32>
    %34 = vector.broadcast %5 : vector<1x128xf32> to vector<32x128xf32>
    %35 = arith.addf %33, %34 : vector<32x128xf32>
    %36 = vector.broadcast %14 : vector<1x128xf32> to vector<32x128xf32>
    %37 = arith.mulf %35, %36 : vector<32x128xf32>
    %38 = arith.index_cast %29 : i32 to index
    %c0_17 = arith.constant 0 : index
    %39 = vector.load %arg8[%38, %c0_17] : memref<64x128xf32, #tpu.memory_space<vmem>>, vector<32x128xf32>
    tpu.vector_store %arg8[%38, %c0_17], %37 {strides = array<i32>} : memref<64x128xf32, #tpu.memory_space<vmem>>, vector<32x128xf32>,
    %c0_18 = arith.constant 0 : index
    %c0_19 = arith.constant 0 : index
    %40 = vector.load %arg6[%c0_18, %c0_19] : memref<8x32xf32, #tpu.memory_space<vmem>>, vector<8x32xf32>
    %c0_20 = arith.constant 0 : index
    %c0_21 = arith.constant 0 : index
    %41 = vector.load %arg7[%c0_20, %c0_21] : memref<8x32xf32, #tpu.memory_space<vmem>>, vector<8x32xf32>
    %c0_i32_22 = arith.constant 0 : i32
    %c2_i32 = arith.constant 2 : i32
    %42 = arith.addi %c0_i32_22, %c2_i32 : i32
    %c1_i32 = arith.constant 1 : i32
    %43:2 = scf.for %arg9 = %c0_i32_22 to %42 step %c1_i32 iter_args(%arg10 = %40, %arg11 = %41) -> (vector<8x32xf32>, vector<8x32xf32>)  : i32 {
      %c1_i32_28 = arith.constant 1 : i32
      %46 = arith.addi %arg9, %c1_i32_28 : i32
      %c2_i32_29 = arith.constant 2 : i32
      %47 = arith.cmpi slt, %46, %c2_i32_29 : i32
      %48 = arith.extui %47 : i1 to i32
      %c0_i32_30 = arith.constant 0 : i32
      %49 = arith.cmpi ne, %48, %c0_i32_30 : i32
      scf.if %49 {
        %c1_i32_64 = arith.constant 1 : i32
        %174 = arith.addi %arg9, %c1_i32_64 : i32
        %c2_i32_65 = arith.constant 2 : i32
        %c0_i32_66 = arith.constant 0 : i32
        %175 = arith.cmpi eq, %c2_i32_65, %c0_i32_66 : i32
        %c1_i32_67 = arith.constant 1 : i32
        %176 = arith.select %175, %c1_i32_67, %c2_i32_65 : i32
        %177 = arith.remsi %174, %176 : i32
        %c0_i32_68 = arith.constant 0 : i32
        %178 = arith.cmpi ne, %177, %c0_i32_68 : i32
        %c0_i32_69 = arith.constant 0 : i32
        %179 = arith.cmpi slt, %177, %c0_i32_69 : i32
        %c0_i32_70 = arith.constant 0 : i32
        %180 = arith.cmpi slt, %176, %c0_i32_70 : i32
        %181 = arith.xori %179, %180 : i1
        %182 = arith.andi %181, %178 : i1
        %183 = arith.addi %177, %176 : i32
        %184 = arith.select %182, %183, %177 : i32
        %c32_i32_71 = arith.constant 32 : i32
        %185 = arith.muli %184, %c32_i32_71 : i32
        %186 = tpu.assume_multiple %185, 32 : i32
        %c32_i32_72 = arith.constant 32 : i32
        %187 = arith.muli %174, %c32_i32_72 : i32
        %188 = tpu.assume_multiple %187, 32 : i32
        %189 = arith.index_cast %188 : i32 to index
        %c0_73 = arith.constant 0 : index
        %190 = vector.load %arg1[%189, %c0_73] : memref<64x32xf32, #tpu.memory_space<vmem>>, vector<32x32xf32>
        %cst_74 = arith.constant dense<0.000000e+00> : vector<32x128xf32>
        %191 = tpu.matmul %190, %3, %cst_74 {dimension_numbers = #tpu.dot_dimension_numbers<[1], [0], [0], [1], [0, 0, 1, 1], [], []>} : vector<32x32xf32>, vector<32x128xf32>, vector<32x128xf32> -> vector<32x128xf32>
        %192 = vector.broadcast %5 : vector<1x128xf32> to vector<32x128xf32>
        %193 = arith.addf %191, %192 : vector<32x128xf32>
        %194 = vector.broadcast %14 : vector<1x128xf32> to vector<32x128xf32>
        %195 = arith.mulf %193, %194 : vector<32x128xf32>
        %196 = arith.index_cast %186 : i32 to index
        %c0_75 = arith.constant 0 : index
        %197 = vector.load %arg8[%196, %c0_75] : memref<64x128xf32, #tpu.memory_space<vmem>>, vector<32x128xf32>
        tpu.vector_store %arg8[%196, %c0_75], %195 {strides = array<i32>} : memref<64x128xf32, #tpu.memory_space<vmem>>, vector<32x128xf32>,
      } else {
      }
      %c2_i32_31 = arith.constant 2 : i32
      %c0_i32_32 = arith.constant 0 : i32
      %50 = arith.cmpi eq, %c2_i32_31, %c0_i32_32 : i32
      %c1_i32_33 = arith.constant 1 : i32
      %51 = arith.select %50, %c1_i32_33, %c2_i32_31 : i32
      %52 = arith.remsi %arg9, %51 : i32
      %c0_i32_34 = arith.constant 0 : i32
      %53 = arith.cmpi ne, %52, %c0_i32_34 : i32
      %c0_i32_35 = arith.constant 0 : i32
      %54 = arith.cmpi slt, %52, %c0_i32_35 : i32
      %c0_i32_36 = arith.constant 0 : i32
      %55 = arith.cmpi slt, %51, %c0_i32_36 : i32
      %56 = arith.xori %54, %55 : i1
      %57 = arith.andi %56, %53 : i1
      %58 = arith.addi %52, %51 : i32
      %59 = arith.select %57, %58, %52 : i32
      %c32_i32 = arith.constant 32 : i32
      %60 = arith.muli %59, %c32_i32 : i32
      %c32_i32_37 = arith.constant 32 : i32
      %61 = arith.muli %arg9, %c32_i32_37 : i32
      %c0_i32_38 = arith.constant 0 : i32
      %c8_i32 = arith.constant 8 : i32
      %62 = arith.muli %c0_i32_38, %c8_i32 : i32
      %63 = arith.addi %60, %62 : i32
      %64 = tpu.assume_multiple %63, 8 : i32
      %c8_i32_39 = arith.constant 8 : i32
      %65 = arith.muli %c0_i32_38, %c8_i32_39 : i32
      %66 = arith.addi %61, %65 : i32
      %67 = tpu.assume_multiple %66, 8 : i32
      %cst_40 = arith.constant dense<0.000000e+00> : vector<8x128xf32>
      %68 = tpu.matmul %arg10, %28, %cst_40 {dimension_numbers = #tpu.dot_dimension_numbers<[1], [0], [0], [1], [0, 0, 1, 1], [], []>} : vector<8x32xf32>, vector<32x128xf32>, vector<8x128xf32> -> vector<8x128xf32>
      %69 = arith.index_cast %64 : i32 to index
      %c0_41 = arith.constant 0 : index
      %70 = vector.load %arg8[%69, %c0_41] : memref<64x128xf32, #tpu.memory_space<vmem>>, vector<8x128xf32>
      %71 = arith.addf %68, %70 : vector<8x128xf32>
      %72 = arith.negf %71 : vector<8x128xf32>
      %73 = math.exp %72 : vector<8x128xf32>
      %cst_42 = arith.constant 1.000000e+00 : f32
      %74 = vector.broadcast %cst_42 : f32 to vector<8x128xf32>
      %75 = arith.addf %74, %73 : vector<8x128xf32>
      %76 = arith.divf %74, %75 : vector<8x128xf32>
      %77 = arith.mulf %76, %23 : vector<8x128xf32>
      %78 = arith.addf %77, %26 : vector<8x128xf32>
      %79 = vector.extract_strided_slice %78 {offsets = [0, 0], sizes = [8, 32], strides = [1, 1]} : vector<8x128xf32> to vector<8x32xf32>
      %80 = vector.extract_strided_slice %78 {offsets = [0, 32], sizes = [8, 32], strides = [1, 1]} : vector<8x128xf32> to vector<8x32xf32>
      %81 = vector.extract_strided_slice %78 {offsets = [0, 64], sizes = [8, 32], strides = [1, 1]} : vector<8x128xf32> to vector<8x32xf32>
      %82 = vector.extract_strided_slice %78 {offsets = [0, 96], sizes = [8, 32], strides = [1, 1]} : vector<8x128xf32> to vector<8x32xf32>
      %83 = arith.mulf %arg11, %79 : vector<8x32xf32>
      %84 = arith.mulf %81, %80 : vector<8x32xf32>
      %85 = arith.addf %83, %84 : vector<8x32xf32>
      %86 = math.tanh %85 : vector<8x32xf32>
      %87 = arith.mulf %82, %86 : vector<8x32xf32>
      %88 = arith.index_cast %67 : i32 to index
      %c0_43 = arith.constant 0 : index
      %89 = vector.load %arg5[%88, %c0_43] : memref<64x32xf32, #tpu.memory_space<vmem>>, vector<8x32xf32>
      tpu.vector_store %arg5[%88, %c0_43], %87 {strides = array<i32>} : memref<64x32xf32, #tpu.memory_space<vmem>>, vector<8x32xf32>,
      %c1_i32_44 = arith.constant 1 : i32
      %c8_i32_45 = arith.constant 8 : i32
      %90 = arith.muli %c1_i32_44, %c8_i32_45 : i32
      %91 = arith.addi %60, %90 : i32
      %92 = tpu.assume_multiple %91, 8 : i32
      %c8_i32_46 = arith.constant 8 : i32
      %93 = arith.muli %c1_i32_44, %c8_i32_46 : i32
      %94 = arith.addi %61, %93 : i32
      %95 = tpu.assume_multiple %94, 8 : i32
      %cst_47 = arith.constant dense<0.000000e+00> : vector<8x128xf32>
      %96 = tpu.matmul %87, %28, %cst_47 {dimension_numbers = #tpu.dot_dimension_numbers<[1], [0], [0], [1], [0, 0, 1, 1], [], []>} : vector<8x32xf32>, vector<32x128xf32>, vector<8x128xf32> -> vector<8x128xf32>
      %97 = arith.index_cast %92 : i32 to index
      %c0_48 = arith.constant 0 : index
      %98 = vector.load %arg8[%97, %c0_48] : memref<64x128xf32, #tpu.memory_space<vmem>>, vector<8x128xf32>
      %99 = arith.addf %96, %98 : vector<8x128xf32>
      %100 = arith.negf %99 : vector<8x128xf32>
      %101 = math.exp %100 : vector<8x128xf32>
      %cst_49 = arith.constant 1.000000e+00 : f32
      %102 = vector.broadcast %cst_49 : f32 to vector<8x128xf32>
      %103 = arith.addf %102, %101 : vector<8x128xf32>
      %104 = arith.divf %102, %103 : vector<8x128xf32>
      %105 = arith.mulf %104, %23 : vector<8x128xf32>
      %106 = arith.addf %105, %26 : vector<8x128xf32>
      %107 = vector.extract_strided_slice %106 {offsets = [0, 0], sizes = [8, 32], strides = [1, 1]} : vector<8x128xf32> to vector<8x32xf32>
      %108 = vector.extract_strided_slice %106 {offsets = [0, 32], sizes = [8, 32], strides = [1, 1]} : vector<8x128xf32> to vector<8x32xf32>
      %109 = vector.extract_strided_slice %106 {offsets = [0, 64], sizes = [8, 32], strides = [1, 1]} : vector<8x128xf32> to vector<8x32xf32>
      %110 = vector.extract_strided_slice %106 {offsets = [0, 96], sizes = [8, 32], strides = [1, 1]} : vector<8x128xf32> to vector<8x32xf32>
      %111 = arith.mulf %85, %107 : vector<8x32xf32>
      %112 = arith.mulf %109, %108 : vector<8x32xf32>
      %113 = arith.addf %111, %112 : vector<8x32xf32>
      %114 = math.tanh %113 : vector<8x32xf32>
      %115 = arith.mulf %110, %114 : vector<8x32xf32>
      %116 = arith.index_cast %95 : i32 to index
      %c0_50 = arith.constant 0 : index
      %117 = vector.load %arg5[%116, %c0_50] : memref<64x32xf32, #tpu.memory_space<vmem>>, vector<8x32xf32>
      tpu.vector_store %arg5[%116, %c0_50], %115 {strides = array<i32>} : memref<64x32xf32, #tpu.memory_space<vmem>>, vector<8x32xf32>,
      %c2_i32_51 = arith.constant 2 : i32
      %c8_i32_52 = arith.constant 8 : i32
      %118 = arith.muli %c2_i32_51, %c8_i32_52 : i32
      %119 = arith.addi %60, %118 : i32
      %120 = tpu.assume_multiple %119, 8 : i32
      %c8_i32_53 = arith.constant 8 : i32
      %121 = arith.muli %c2_i32_51, %c8_i32_53 : i32
      %122 = arith.addi %61, %121 : i32
      %123 = tpu.assume_multiple %122, 8 : i32
      %cst_54 = arith.constant dense<0.000000e+00> : vector<8x128xf32>
      %124 = tpu.matmul %115, %28, %cst_54 {dimension_numbers = #tpu.dot_dimension_numbers<[1], [0], [0], [1], [0, 0, 1, 1], [], []>} : vector<8x32xf32>, vector<32x128xf32>, vector<8x128xf32> -> vector<8x128xf32>
      %125 = arith.index_cast %120 : i32 to index
      %c0_55 = arith.constant 0 : index
      %126 = vector.load %arg8[%125, %c0_55] : memref<64x128xf32, #tpu.memory_space<vmem>>, vector<8x128xf32>
      %127 = arith.addf %124, %126 : vector<8x128xf32>
      %128 = arith.negf %127 : vector<8x128xf32>
      %129 = math.exp %128 : vector<8x128xf32>
      %cst_56 = arith.constant 1.000000e+00 : f32
      %130 = vector.broadcast %cst_56 : f32 to vector<8x128xf32>
      %131 = arith.addf %130, %129 : vector<8x128xf32>
      %132 = arith.divf %130, %131 : vector<8x128xf32>
      %133 = arith.mulf %132, %23 : vector<8x128xf32>
      %134 = arith.addf %133, %26 : vector<8x128xf32>
      %135 = vector.extract_strided_slice %134 {offsets = [0, 0], sizes = [8, 32], strides = [1, 1]} : vector<8x128xf32> to vector<8x32xf32>
      %136 = vector.extract_strided_slice %134 {offsets = [0, 32], sizes = [8, 32], strides = [1, 1]} : vector<8x128xf32> to vector<8x32xf32>
      %137 = vector.extract_strided_slice %134 {offsets = [0, 64], sizes = [8, 32], strides = [1, 1]} : vector<8x128xf32> to vector<8x32xf32>
      %138 = vector.extract_strided_slice %134 {offsets = [0, 96], sizes = [8, 32], strides = [1, 1]} : vector<8x128xf32> to vector<8x32xf32>
      %139 = arith.mulf %113, %135 : vector<8x32xf32>
      %140 = arith.mulf %137, %136 : vector<8x32xf32>
      %141 = arith.addf %139, %140 : vector<8x32xf32>
      %142 = math.tanh %141 : vector<8x32xf32>
      %143 = arith.mulf %138, %142 : vector<8x32xf32>
      %144 = arith.index_cast %123 : i32 to index
      %c0_57 = arith.constant 0 : index
      %145 = vector.load %arg5[%144, %c0_57] : memref<64x32xf32, #tpu.memory_space<vmem>>, vector<8x32xf32>
      tpu.vector_store %arg5[%144, %c0_57], %143 {strides = array<i32>} : memref<64x32xf32, #tpu.memory_space<vmem>>, vector<8x32xf32>,
      %c3_i32 = arith.constant 3 : i32
      %c8_i32_58 = arith.constant 8 : i32
      %146 = arith.muli %c3_i32, %c8_i32_58 : i32
      %147 = arith.addi %60, %146 : i32
      %148 = tpu.assume_multiple %147, 8 : i32
      %c8_i32_59 = arith.constant 8 : i32
      %149 = arith.muli %c3_i32, %c8_i32_59 : i32
      %150 = arith.addi %61, %149 : i32
      %151 = tpu.assume_multiple %150, 8 : i32
      %cst_60 = arith.constant dense<0.000000e+00> : vector<8x128xf32>
      %152 = tpu.matmul %143, %28, %cst_60 {dimension_numbers = #tpu.dot_dimension_numbers<[1], [0], [0], [1], [0, 0, 1, 1], [], []>} : vector<8x32xf32>, vector<32x128xf32>, vector<8x128xf32> -> vector<8x128xf32>
      %153 = arith.index_cast %148 : i32 to index
      %c0_61 = arith.constant 0 : index
      %154 = vector.load %arg8[%153, %c0_61] : memref<64x128xf32, #tpu.memory_space<vmem>>, vector<8x128xf32>
      %155 = arith.addf %152, %154 : vector<8x128xf32>
      %156 = arith.negf %155 : vector<8x128xf32>
      %157 = math.exp %156 : vector<8x128xf32>
      %cst_62 = arith.constant 1.000000e+00 : f32
      %158 = vector.broadcast %cst_62 : f32 to vector<8x128xf32>
      %159 = arith.addf %158, %157 : vector<8x128xf32>
      %160 = arith.divf %158, %159 : vector<8x128xf32>
      %161 = arith.mulf %160, %23 : vector<8x128xf32>
      %162 = arith.addf %161, %26 : vector<8x128xf32>
      %163 = vector.extract_strided_slice %162 {offsets = [0, 0], sizes = [8, 32], strides = [1, 1]} : vector<8x128xf32> to vector<8x32xf32>
      %164 = vector.extract_strided_slice %162 {offsets = [0, 32], sizes = [8, 32], strides = [1, 1]} : vector<8x128xf32> to vector<8x32xf32>
      %165 = vector.extract_strided_slice %162 {offsets = [0, 64], sizes = [8, 32], strides = [1, 1]} : vector<8x128xf32> to vector<8x32xf32>
      %166 = vector.extract_strided_slice %162 {offsets = [0, 96], sizes = [8, 32], strides = [1, 1]} : vector<8x128xf32> to vector<8x32xf32>
      %167 = arith.mulf %141, %163 : vector<8x32xf32>
      %168 = arith.mulf %165, %164 : vector<8x32xf32>
      %169 = arith.addf %167, %168 : vector<8x32xf32>
      %170 = math.tanh %169 : vector<8x32xf32>
      %171 = arith.mulf %166, %170 : vector<8x32xf32>
      %172 = arith.index_cast %151 : i32 to index
      %c0_63 = arith.constant 0 : index
      %173 = vector.load %arg5[%172, %c0_63] : memref<64x32xf32, #tpu.memory_space<vmem>>, vector<8x32xf32>
      tpu.vector_store %arg5[%172, %c0_63], %171 {strides = array<i32>} : memref<64x32xf32, #tpu.memory_space<vmem>>, vector<8x32xf32>,
      %c4_i32 = arith.constant 4 : i32
      scf.yield %171, %169 : vector<8x32xf32>, vector<8x32xf32>
    }
    %c2_i32_23 = arith.constant 2 : i32
    %c0_24 = arith.constant 0 : index
    %c0_25 = arith.constant 0 : index
    %44 = vector.load %arg6[%c0_24, %c0_25] : memref<8x32xf32, #tpu.memory_space<vmem>>, vector<8x32xf32>
    tpu.vector_store %arg6[%c0_24, %c0_25], %43#0 {strides = array<i32>} : memref<8x32xf32, #tpu.memory_space<vmem>>, vector<8x32xf32>,
    %c0_26 = arith.constant 0 : index
    %c0_27 = arith.constant 0 : index
    %45 = vector.load %arg7[%c0_26, %c0_27] : memref<8x32xf32, #tpu.memory_space<vmem>>, vector<8x32xf32>
    tpu.vector_store %arg7[%c0_26, %c0_27], %43#1 {strides = array<i32>} : memref<8x32xf32, #tpu.memory_space<vmem>>, vector<8x32xf32>,
    return
  }
  func.func @transform_0(%arg0: i32) -> (i32, i32) {
    %c0_i32 = arith.constant 0 : i32
    %c0_i32_0 = arith.constant 0 : i32
    return %arg0, %c0_i32 : i32, i32
  }
  func.func @transform_1(%arg0: i32) -> (i32, i32) {
    %c0_i32 = arith.constant 0 : i32
    %c0_i32_0 = arith.constant 0 : i32
    %c0_i32_1 = arith.constant 0 : i32
    return %c0_i32, %c0_i32_0 : i32, i32
  }
  func.func @transform_2(%arg0: i32) -> (i32, i32) {
    %c0_i32 = arith.constant 0 : i32
    %c0_i32_0 = arith.constant 0 : i32
    %c0_i32_1 = arith.constant 0 : i32
    return %c0_i32, %c0_i32_0 : i32, i32
  }
  func.func @transform_3(%arg0: i32) -> (i32, i32) {
    %c0_i32 = arith.constant 0 : i32
    %c0_i32_0 = arith.constant 0 : i32
    %c0_i32_1 = arith.constant 0 : i32
    return %c0_i32, %c0_i32_0 : i32, i32
  }
  func.func @transform_4(%arg0: i32) -> (i32, i32) {
    %c0_i32 = arith.constant 0 : i32
    %c0_i32_0 = arith.constant 0 : i32
    return %arg0, %c0_i32 : i32, i32
  }
  func.func @transform_5(%arg0: i32) -> (i32, i32) {
    %c0_i32 = arith.constant 0 : i32
    %c0_i32_0 = arith.constant 0 : i32
    %c0_i32_1 = arith.constant 0 : i32
    return %c0_i32, %c0_i32_0 : i32, i32
  }
  func.func @transform_6(%arg0: i32) -> (i32, i32) {
    %c0_i32 = arith.constant 0 : i32
    %c0_i32_0 = arith.constant 0 : i32
    %c0_i32_1 = arith.constant 0 : i32
    return %c0_i32, %c0_i32_0 : i32, i32
  }
}

</mosaic_0001>

<bundles_post_ra>
// kernel: tpu_custom_call.1
= control target key start
LH: loop header
LB: loop body
LE: loop exit
PB: predicated region body
PF: predicated region fallthrough
CT: control target
= control target key end

     0   :  { %12 = vsyncpa [#allocation4], 0  ;;  %s1440_s0 = inlined_call_operand.vmem [shape: f32[64,32], index: 0, kind: input, shape index: {}]   ;;  %s1441_s1 = inlined_call_operand.vmem [shape: f32[32,128], index: 1, kind: input, shape index: {}]   ;;  %s1442_s2 = inlined_call_operand.vmem [shape: f32[32,128], index: 2, kind: input, shape index: {}]   ;;  %s1443_s3 = inlined_call_operand.vmem [shape: f32[1,128], index: 3, kind: input, shape index: {}]   ;;  %s1444_s4 = inlined_call_operand.vmem [shape: f32[64,32], index: 4, kind: output, shape index: {0}]   ;;  %s1445_s5 = inlined_call_operand.hbm [shape: f32[8,32], index: 5, kind: output, shape index: {1}]   ;;  %s1446_s6 = inlined_call_operand.hbm [shape: f32[8,32], index: 6, kind: output, shape index: {2}]  }
   0x1   :  { %13 = vsyncpa [#allocation6], 0  ;;  %v29_v0 = vld [vmem:[%s1441_s1] sm:$0xff]  ;;  %v30_v1 = vld [vmem:[%s1441_s1 + $0x8] sm:$0xff]  ;;  %vm26_vm0 = vcmask 261120   ;;  %v38_v2 = vlaneseq  ;;  %v1148_v6 = vmov 0.0  }
   0x2   :  { %v1199_v3 = vpack.c.bf16 %v30_v1, %v29_v0  ;;  %v31_v4 = vld [vmem:[%s1441_s1 + $0x10] sm:$0xff]  ;;  %v32_v5 = vld [vmem:[%s1441_s1 + $0x18] sm:$0xff]  ;;  %27 = vst.msk [vmem:[#allocation3] sm:$0xff] %vm26_vm0, %v1148_v6  ;;  %28 = vst.msk [vmem:[#allocation5] sm:$0xff] %vm26_vm0, %v1148_v6  ;;  %v1149_v15 = vmov 1.0  }
   0x3   :  { %v49_v7 = vld [vmem:[%s1440_s0] sm:$0xff]  ;;  %v1212_v8 = vpack.c.bf16 %v32_v5, %v31_v4  ;;  %v39_v9 = vand.u32 127, %v38_v2  ;;  %v51_v10 = vld [vmem:[%s1440_s0 + $0x10] sm:$0xff]  ;;  %v34_v12 = vld [vmem:[%s1442_s2 + $0x8] sm:$0xff] }
   0x4   :  { %906 = vmatprep.mubr.msk.f32.mxu0 %vm26_vm0, %v49_v7  ;;  %971 = vmatprep.subr.bf16.mxu0 %v1199_v3  ;;  %v33_v11 = vld [vmem:[%s1442_s2] sm:$0xff]  ;;  %v35_v13 = vld [vmem:[%s1442_s2 + $0x10] sm:$0xff]  ;;  %v36_v14 = vld [vmem:[%s1442_s2 + $0x18] sm:$0xff] }
   0x5   :  { %1010 = vmatprep.subr.bf16.mxu1 %v1199_v3  ;;  %973 = vmatpush3.bf16.msra.mxu0 %v1199_v3  ;;  %vm40_vm1 = vcmp.ge.s32.totalorder %v39_v9, 64  ;;  %vm41_vm2 = vcmp.lt.s32.totalorder %v39_v9, 96  ;;  %v50_v18 = vld [vmem:[%s1440_s0 + $0x8] sm:$0xff]  ;;  %v52_v25 = vld [vmem:[%s1440_s0 + $0x18] sm:$0xff]  ;;  %v1266_v26 = vld [vmem:[%s1443_s3] ss:$0 sm:$0xff] }
   0x6   :  { %1012 = vmatpush3.bf16.msra.mxu1 %v1199_v3  ;;  %975 = vmatprep.subr.bf16.mxu0 %v1212_v8  ;;  %vm42_vm3 = vmand %vm40_vm1, %vm41_vm2  ;;  %s1280_s3 = smov 0  }
   0x7   :  { %1011 = vmatprep.subr.bf16.mxu1 %v1212_v8  ;;  %909 = vmatprep.mubr.msk.f32.mxu1 %vm26_vm0, %v51_v10  ;;  %v1237_v16 = vsel %vm42_vm3, 2.0, %v1149_v15  ;;  %v1239_v17 = vsel %vm42_vm3, -1.0, %v1148_v6 }
   0x8   :  { %v1245_v19 = vmul.f32 %v1237_v16, %v33_v11  ;;  %v1248_v20 = vmul.f32 %v1237_v16, %v34_v12  ;;  %v1251_v21 = vmul.f32 %v1237_v16, %v35_v13  ;;  %v1254_v22 = vmul.f32 %v1237_v16, %v36_v14 }
   0x9   :  { %977 = vmatpush3.bf16.msra.mxu0 %v1212_v8  ;;  %v165_v23 = vld [vmem:[#allocation3] sm:$0xff]   ;;  %v166_v24 = vld [vmem:[#allocation5] sm:$0xff]  }
   0xa   :  { %1013 = vmatpush3.bf16.msra.mxu1 %v1212_v8 }
   0xc   :  { %907 = vmatmul.mubr.msk.f32.vlgmr.msra.gmra.mrb[0].mxu0 %vm26_vm0, %v50_v18 }
   0xd   :  { %910 = vmatmul.mubr.msk.f32.vlgmr.msra.gmra.mrb[0].mxu1 %vm26_vm0, %v52_v25 }
  0xdf   :  { %v908_v27 = vpop.f32.mrb[0].mxu0 }
  0xe0   :  { %v911_v28 = vpop.f32.mrb[0].mxu1  ;;  %v144_v29 = vadd.f32 %v908_v27, %v1266_v26  ;;  %v138_v31 = vpop.f32.mrb[1].mxu0 }
  0xe1   :  { %v154_v30 = vadd.f32 %v911_v28, %v1266_v26  ;;  %v148_v32 = vpop.f32.mrb[1].mxu1  ;;  %v139_v33 = vadd.f32 %v1266_v26, %v138_v31 }
  0xe2   :  { %v149_v34 = vadd.f32 %v1266_v26, %v148_v32  ;;  %v158_v35 = vmul.f32 %v144_v29, %v1237_v16 }
  0xe3   :  { %v160_v36 = vmul.f32 %v154_v30, %v1237_v16  ;;  %v157_v37 = vmul.f32 %v139_v33, %v1237_v16 }
  0xe4   :  { %v159_v38 = vmul.f32 %v149_v34, %v1237_v16  ;;  %162 = vst [vmem:[#allocation2 + $0x8] sm:$0xff] %v158_v35 }
  0xe5   :  { %164 = vst [vmem:[#allocation2 + $0x18] sm:$0xff] %v160_v36  ;;  %161 = vst [vmem:[#allocation2] sm:$0xff] %v157_v37 }
  0xe6   :  { %163 = vst [vmem:[#allocation2 + $0x10] sm:$0xff] %v159_v38 }
  0xe7 LB: > { %s1292_s21 = sadd.s32 1, %s1146_s3   ;;  %s1146_s3 = sphi %s1280_s3, %s1449_s3   ;;  %v1142_v23 = vphi %v165_v23, %v1448_v23   ;;  %v1138_v24 = vphi %v166_v24, %v1447_v24  }
  0xe8   : > { %p823_p0 = scmp.ge.s32.totalorder %s1292_s21, 2 }
  0xe9   : > { %979 = vmatprep.subr.bf16.mxu0 (!%p823_p0), %v1199_v3  ;;  %1014 = vmatprep.subr.bf16.mxu1 (!%p823_p0), %v1199_v3  ;;  %s828_s22 = sshll.u32 (!%p823_p0), %s1146_s3, 5  ;;  %s181_s26 = ssub.s32 (!%p823_p0), 0, %s1292_s21 }
  0xea   : > { %179 = sbr.rel (%p823_p0) target bundleno = 459 (0x1cb), region = 32  ;;  %981 = vmatpush3.bf16.msra.mxu0 (!%p823_p0), %v1199_v3  ;;  %1016 = vmatpush3.bf16.msra.mxu1 (!%p823_p0), %v1199_v3  ;;  %s781_s25 = scalar_lea.vmem (!%p823_p0), %s1440_s0, %s828_s22 }
  0xeb   : > { %983 = vmatprep.subr.bf16.mxu0 (!%p823_p0), %v1212_v8  ;;  %1015 = vmatprep.subr.bf16.mxu1 (!%p823_p0), %v1212_v8  ;;  %v829_v39 = vld [vmem:[%s781_s25 + $0x20] sm:$0xff] (!%p823_p0)  ;;  %v831_v40 = vld [vmem:[%s781_s25 + $0x30] sm:$0xff] (!%p823_p0)  ;;  %v830_v41 = vld [vmem:[%s781_s25 + $0x28] sm:$0xff] (!%p823_p0)  ;;  %s824_s27 = smin.u32 (!%p823_p0), %s181_s26, %s1292_s21  ;;  %p180_p1 = scmp.lt.s32.totalorder (!%p823_p0), %s1292_s21, 0 }
  0xec   : > { %920 = vmatprep.mubr.msk.f32.mxu0 (!%p823_p0), %vm26_vm0, %v829_v39  ;;  %923 = vmatprep.mubr.msk.f32.mxu1 (!%p823_p0), %vm26_vm0, %v831_v40  ;;  %v832_v42 = vld [vmem:[%s781_s25 + $0x38] sm:$0xff] (!%p823_p0)  ;;  %s183_s28 = sand.u32 (!%p823_p0), 1, %s824_s27  }
  0xed   : > { %s184_s29 = ssub.s32 (!%p823_p0), 0, %s183_s28 }
  0xee   : > { %985 = vmatpush3.bf16.msra.mxu0 (!%p823_p0), %v1212_v8  ;;  %1017 = vmatpush3.bf16.msra.mxu1 (!%p823_p0), %v1212_v8 }
  0xf1   : > { %921 = vmatmul.mubr.msk.f32.vlgmr.msra.gmra.mrb[0].mxu0 %vm26_vm0, %v830_v41  ;;  %924 = vmatmul.mubr.msk.f32.vlgmr.msra.gmra.mrb[0].mxu1 %vm26_vm0, %v832_v42  ;;  %s1451_s29 = smov (!%p180_p1, %s184_s29), %s183_s28 }
  0xf2   : > { %p826_p2 = scmp.lt.s32.totalorder %s1451_s29, 0  ;;  %s190_s30 = sadd.s32 2, %s1451_s29 }
  0xf4   : > { %s1453_s30 = smov (!%p826_p2, %s190_s30), %s1451_s29 }
  0xf5   : > { %s827_s7 = sshll.u32 %s1453_s30, 5 }
  0xf6   : > { %s300_s1 = scalar_lea.vmem [#allocation2], %s827_s7 }
 0x1c4   : > { %v922_v43 = vpop.f32.mrb[0].mxu0  ;;  %v925_v44 = vpop.f32.mrb[0].mxu1 }
 0x1c5   : > { %v283_v45 = vadd.f32 %v922_v43, %v1266_v26  ;;  %v293_v46 = vadd.f32 %v925_v44, %v1266_v26  ;;  %v277_v47 = vpop.f32.mrb[1].mxu0  ;;  %v287_v48 = vpop.f32.mrb[1].mxu1 }
 0x1c6   : > { %v278_v49 = vadd.f32 %v1266_v26, %v277_v47  ;;  %v288_v50 = vadd.f32 %v1266_v26, %v287_v48 }
 0x1c7   : > { %v297_v51 = vmul.f32 %v283_v45, %v1237_v16  ;;  %v299_v52 = vmul.f32 %v293_v46, %v1237_v16 }
 0x1c8   : > { %v296_v53 = vmul.f32 %v278_v49, %v1237_v16  ;;  %v298_v54 = vmul.f32 %v288_v50, %v1237_v16 }
 0x1c9   : > { %302 = vst [vmem:[%s300_s1 + $0x8] sm:$0xff] %v297_v51  ;;  %304 = vst [vmem:[%s300_s1 + $0x18] sm:$0xff] %v299_v52 }
 0x1ca   : > { %301 = vst [vmem:[%s300_s1] sm:$0xff] %v296_v53  ;;  %303 = vst [vmem:[%s300_s1 + $0x10] sm:$0xff] %v298_v54 }
 0x1cb PF: > { %v1326_v55 = vpack.c.bf16 %v1248_v20, %v1245_v19  ;;  %v1150_v56 = vmov 0.0|0.0   ;;  %v1333_v57 = vpack.c.bf16 %v1254_v22, %v1251_v21  ;;  %vm1151_vm4 = vmmov 0   ;;  %s306_s8 = ssub.s32 0, %s1146_s3  ;;  %p305_p3 = scmp.lt.s32.totalorder %s1146_s3, 0 }
 0x1cc   : > { %986 = vmatprep.subr.bf16.mxu0 %v1150_v56  ;;  %992 = vmatprep.subr.bf16.mxu1 %v1150_v56  ;;  %v1152_v58 = vmov 0.0   ;;  %s837_s9 = smin.u32 %s1146_s3, %s306_s8  ;;  %s1153_s15 = smov 32  }
 0x1cd   : > { %988 = vmatpush3.bf16.msra.mxu0 %v1326_v55  ;;  %934 = vmatprep.mubr.msk.f32.mxu0 %vm1151_vm4, %v1152_v58  ;;  %s308_s10 = sand.u32 1, %s837_s9   ;;  %s1154_s16 = smov 64  }
 0x1ce   : > { %989 = vmatprep.subr.bf16.mxu0 %v1150_v56  ;;  %994 = vmatpush3.bf16.msra.mxu1 %v1326_v55  ;;  %s309_s11 = ssub.s32 0, %s308_s10  ;;  %s1155_s17 = smov 96  }
 0x1cf   : > { %995 = vmatprep.subr.bf16.mxu1 %v1150_v56  ;;  %945 = vmatprep.mubr.msk.f32.mxu1 %vm1151_vm4, %v1152_v58  ;;  %s1455_s11 = smov (!%p305_p3, %s309_s11), %s308_s10  ;;  %s841_s2 = sshll.u32 %s1146_s3, 5 }
 0x1d0   : > { %p839_p4 = scmp.lt.s32.totalorder %s1455_s11, 0  ;;  %s315_s12 = sadd.s32 2, %s1455_s11 }
 0x1d1   : > { %991 = vmatpush3.bf16.msra.mxu0 %v1333_v57  ;;  %s1367_s20 = scalar_lea.vmem %s1444_s4, %s841_s2  ;;  %s1449_s3 = smov %s1292_s21 }
 0x1d2   : > { %997 = vmatpush3.bf16.msra.mxu1 %v1333_v57  ;;  %998 = vmatprep.subr.bf16.mxu0 %v1150_v56  ;;  %s1457_s12 = smov (!%p839_p4, %s315_s12), %s1455_s11  ;;  %s1156_s3 = smov (%p823_p0), [#allocation3]  }
 0x1d3   : > { %1004 = vmatprep.subr.bf16.mxu1 %v1150_v56  ;;  %s840_s13 = sshll.u32 %s1457_s12, 5  ;;  %s756_s22 = sshll.u32 (%p823_p0), %s1156_s3, 4  ;;  %s757_s22 = int_to_ptr.vmem [resolvable:$true] %s756_s22 }
 0x1d4   : > { %935 = vmatmul.mubr.msk.f32.vlgmr.msra.gmra.mrb[0].mxu0 %vm26_vm0, %v1142_v23  ;;  %s1353_s14 = scalar_lea.vmem [#allocation2], %s840_s13  ;;  %s1157_s23 = smov (%p823_p0), [#allocation5]  }
 0x1d5   : > { %1000 = vmatpush3.bf16.msra.mxu0 %v1326_v55  ;;  %956 = vmatprep.mubr.msk.f32.mxu0 %vm1151_vm4, %v1152_v58  ;;  %v320_v59 = vld [vmem:[%s1353_s14] sm:$0xff]  ;;  %v845_v18 = vld [vmem:[%s1353_s14 + $0x8] sm:$0xff]  ;;  %v851_v42 = vld [vmem:[%s1353_s14 + $0x10] sm:$0xff]  ;;  %s766_s24 = sshll.u32 (%p823_p0), %s1157_s23, 4  ;;  %s1076_s25 = scalar_lea.vmem (%p823_p0), %s757_s22, 128  ;;  %s767_s24 = int_to_ptr.vmem [resolvable:$true] %s766_s24 }
 0x1d6   : > { %1001 = vmatprep.subr.bf16.mxu0 %v1150_v56  ;;  %p1077_p5 = scmp.ne.s32.totalorder (%p823_p0), %s757_s22, %s1076_s25  ;;  %p1081_p6 = scmp.lt.s32.totalorder (%p823_p0), %s757_s22, %s757_s22 }
 0x1d7   :  { %p1082_p7 = scmp.lt.s32.totalorder (%p823_p0), %s1076_s25, %s1076_s25 }
 0x1d9   : > { %1003 = vmatpush3.bf16.msra.mxu0 %v1333_v57  ;;  %p1083_p8 = por (%p823_p0), %p1082_p7, %p1081_p6 }
 0x1db   :  { %p1084_p9 = pnand (%p823_p0), %p1083_p8, %p1077_p5 }
 0x2a7   : > { %v390_v60 = vpop.f32.mrb[0].mxu0 }
 0x2a8   : > { %v391_v61 = vadd.f32 %v390_v60, %v320_v59  ;;  %v936_v62 = vpop.f32.mrb[1].mxu0 }
 0x2aa   : > { %v843_v63 = vmul.f32 -1.442695, %v391_v61  ;;  %v857_v61 = vld [vmem:[%s1353_s14 + $0x18] sm:$0xff] }
 0x2ac   : > { %1052 = vpow2.f32 %v843_v63 }
 0x2b6   : > { %v1053_v0 = vpop.eup %1052 }
 0x2b7   : > { %v397_v1 = vadd.f32 1.0, %v1053_v0 }
 0x2b9   : > { %1054 = vrcp.f32 %v397_v1 }
 0x2c3   : > { %v1055_v2 = vpop.eup %1054 }
 0x2c4   : > { %v400_v4 = vmul.f32 %v1055_v2, %v1237_v16 }
 0x2c6   : > { %v401_v5 = vadd.f32 %v400_v4, %v1239_v17 }
 0x2c8   : > { %404 = vrot.lane.b32.xlu0 %v401_v5, %s1153_s15  ;;  %v402_v9 = vmul.f32 %v1138_v24, %v401_v5 }
 0x33a   : > { %v405_v6 = vpop.permute.xlu0 %404 }
 0x33b   : > { %v407_v7 = vmul.f32 %v405_v6, %v401_v5 }
 0x33d   : > { %409 = vrot.lane.b32.xlu0 %v407_v7, %s1154_s16 }
 0x3af   : > { %v410_v10 = vpop.permute.xlu0 %409 }
 0x3b0   : > { %v412_v11 = vadd.f32 %v410_v10, %v402_v9 }
 0x3b2   : > { %1056 = vtanh.f32 %v412_v11 }
 0x3bc   : > { %v1057_v12 = vpop.eup %1056 }
 0x3bd   : > { %415 = vrot.lane.b32.xlu1 %v1057_v12, %s1155_s17 }
 0x42f   : > { %v416_v13 = vpop.permute.xlu1 %415 }
 0x430   : > { %v418_v14 = vmul.f32 %v416_v13, %v401_v5 }
 0x432   : > { %420 = vrot.lane.b32.xlu1 %v418_v14, %s1153_s15 }
 0x4a4   : > { %v421_v15 = vpop.permute.xlu1 %420 }
 0x4a5   : > { %424 = vst.msk [vmem:[%s1367_s20] sm:$0xff] %vm26_vm0, %v421_v15  ;;  %946 = vmatmul.mubr.msk.f32.vlgmr.msra.gmra.mrb[0].mxu1 %vm26_vm0, %v421_v15 }
 0x4a6   : > { %1006 = vmatpush3.bf16.msra.mxu1 %v1326_v55  ;;  %967 = vmatprep.mubr.msk.f32.mxu1 %vm1151_vm4, %v1152_v58 }
 0x4a7   : > { %1007 = vmatprep.subr.bf16.mxu1 %v1150_v56 }
 0x4aa   : > { %1009 = vmatpush3.bf16.msra.mxu1 %v1333_v57 }
 0x578   : > { %v497_v23 = vpop.f32.mrb[0].mxu1 }
 0x579   : > { %v498_v24 = vadd.f32 %v845_v18, %v497_v23  ;;  %v947_v25 = vpop.f32.mrb[1].mxu1 }
 0x57b   : > { %v847_v27 = vmul.f32 -1.442695, %v498_v24 }
 0x57d   : > { %1058 = vpow2.f32 %v847_v27 }
 0x587   : > { %v1059_v28 = vpop.eup %1058 }
 0x588   : > { %v504_v29 = vadd.f32 1.0, %v1059_v28 }
 0x58a   : > { %1060 = vrcp.f32 %v504_v29 }
 0x594   : > { %v1061_v30 = vpop.eup %1060 }
 0x595   : > { %v507_v31 = vmul.f32 %v1061_v30, %v1237_v16 }
 0x597   : > { %v508_v32 = vadd.f32 %v507_v31, %v1239_v17 }
 0x599   : > { %511 = vrot.lane.b32.xlu0 %v508_v32, %s1153_s15  ;;  %v509_v35 = vmul.f32 %v508_v32, %v412_v11 }
 0x60b   : > { %v512_v33 = vpop.permute.xlu0 %511 }
 0x60c   : > { %v514_v34 = vmul.f32 %v512_v33, %v508_v32 }
 0x60e   : > { %516 = vrot.lane.b32.xlu1 %v514_v34, %s1154_s16 }
 0x680   : > { %v517_v36 = vpop.permute.xlu1 %516 }
 0x681   : > { %v519_v37 = vadd.f32 %v517_v36, %v509_v35 }
 0x683   : > { %1062 = vtanh.f32 %v519_v37 }
 0x68d   : > { %v1063_v38 = vpop.eup %1062 }
 0x68e   : > { %522 = vrot.lane.b32.xlu0 %v1063_v38, %s1155_s17 }
 0x700   : > { %v523_v39 = vpop.permute.xlu0 %522 }
 0x701   : > { %v525_v40 = vmul.f32 %v523_v39, %v508_v32 }
 0x703   : > { %527 = vrot.lane.b32.xlu1 %v525_v40, %s1153_s15 }
 0x775   : > { %v528_v41 = vpop.permute.xlu1 %527 }
 0x776   : > { %849 = vst.msk [vmem:[%s1367_s20 + $0x8] sm:$0xff] %vm26_vm0, %v528_v41  ;;  %957 = vmatmul.mubr.msk.f32.vlgmr.msra.gmra.mrb[2].mxu0 %vm26_vm0, %v528_v41 }
 0x849   : > { %v604_v43 = vpop.f32.mrb[2].mxu0 }
 0x84a   : > { %v605_v44 = vadd.f32 %v851_v42, %v604_v43  ;;  %v958_v45 = vpop.f32.mrb[3].mxu0 }
 0x84c   : > { %v853_v46 = vmul.f32 -1.442695, %v605_v44 }
 0x84e   : > { %1064 = vpow2.f32 %v853_v46 }
 0x858   : > { %v1065_v47 = vpop.eup %1064 }
 0x859   : > { %v611_v48 = vadd.f32 1.0, %v1065_v47 }
 0x85b   : > { %1066 = vrcp.f32 %v611_v48 }
 0x865   : > { %v1067_v49 = vpop.eup %1066 }
 0x866   : > { %v614_v50 = vmul.f32 %v1067_v49, %v1237_v16 }
 0x868   : > { %v615_v51 = vadd.f32 %v614_v50, %v1239_v17 }
 0x86a   : > { %618 = vrot.lane.b32.xlu0 %v615_v51, %s1153_s15  ;;  %v616_v54 = vmul.f32 %v615_v51, %v519_v37 }
 0x8dc   : > { %v619_v52 = vpop.permute.xlu0 %618 }
 0x8dd   : > { %v621_v53 = vmul.f32 %v619_v52, %v615_v51 }
 0x8df   : > { %623 = vrot.lane.b32.xlu1 %v621_v53, %s1154_s16 }
 0x951   : > { %v624_v55 = vpop.permute.xlu1 %623 }
 0x952   : > { %v626_v56 = vadd.f32 %v624_v55, %v616_v54 }
 0x954   : > { %1068 = vtanh.f32 %v626_v56 }
 0x95e   : > { %v1069_v57 = vpop.eup %1068 }
 0x95f   : > { %629 = vrot.lane.b32.xlu0 %v1069_v57, %s1155_s17 }
 0x9d1   : > { %v630_v58 = vpop.permute.xlu0 %629 }
 0x9d2   : > { %v632_v59 = vmul.f32 %v630_v58, %v615_v51 }
 0x9d4   : > { %634 = vrot.lane.b32.xlu1 %v632_v59, %s1153_s15 }
 0xa46   : > { %v635_v60 = vpop.permute.xlu1 %634 }
 0xa47   : > { %855 = vst.msk [vmem:[%s1367_s20 + $0x10] sm:$0xff] %vm26_vm0, %v635_v60  ;;  %968 = vmatmul.mubr.msk.f32.vlgmr.msra.gmra.mrb[2].mxu1 %vm26_vm0, %v635_v60 }
 0xb1a   : > { %v711_v62 = vpop.f32.mrb[2].mxu1 }
 0xb1b   : > { %v712_v63 = vadd.f32 %v857_v61, %v711_v62  ;;  %v969_v0 = vpop.f32.mrb[3].mxu1 }
 0xb1d   : > { %v859_v1 = vmul.f32 -1.442695, %v712_v63 }
 0xb1f   : > { %1070 = vpow2.f32 %v859_v1 }
 0xb29   : > { %v1071_v2 = vpop.eup %1070 }
 0xb2a   : > { %v718_v4 = vadd.f32 1.0, %v1071_v2 }
 0xb2c   : > { %1072 = vrcp.f32 %v718_v4 }
 0xb36   : > { %v1073_v5 = vpop.eup %1072 }
 0xb37   : > { %v721_v6 = vmul.f32 %v1073_v5, %v1237_v16 }
 0xb39   : > { %v722_v7 = vadd.f32 %v721_v6, %v1239_v17 }
 0xb3b   : > { %725 = vrot.lane.b32.xlu0 %v722_v7, %s1153_s15  ;;  %v723_v11 = vmul.f32 %v722_v7, %v626_v56 }
 0xbad   : > { %v726_v9 = vpop.permute.xlu0 %725 }
 0xbae   : > { %v728_v10 = vmul.f32 %v726_v9, %v722_v7 }
 0xbb0   : > { %730 = vrot.lane.b32.xlu1 %v728_v10, %s1154_s16 }
 0xc22   : > { %v731_v12 = vpop.permute.xlu1 %730 }
 0xc23   : > { %v733_v13 = vadd.f32 %v731_v12, %v723_v11  }
 0xc25   : > { %1074 = vtanh.f32 %v733_v13  ;;  %v1447_v24 = vmov %v733_v13  ;;  %747 = vst.msk [vmem:[#allocation5] sm:$0xff] (%p823_p0), %vm26_vm0, %v733_v13 }
 0xc2f   : > { %v1075_v14 = vpop.eup %1074 }
 0xc30   : > { %736 = vrot.lane.b32.xlu0 %v1075_v14, %s1155_s17 }
 0xca2   : > { %v737_v15 = vpop.permute.xlu0 %736 }
 0xca3   : > { %v739_v18 = vmul.f32 %v737_v15, %v722_v7 }
 0xca5   : > { %741 = vrot.lane.b32.xlu1 %v739_v18, %s1153_s15 }
 0xd12   :  { %171 = sbr.rel (!%p823_p0) target bundleno = 231 (0xe7), region = 77 }
 0xd17   : > { %v742_v25 = vpop.permute.xlu1 %741  }
 0xd18   : > { %861 = vst.msk [vmem:[%s1367_s20 + $0x18] sm:$0xff] %vm26_vm0, %v742_v25  ;;  %v1448_v23 = vmov %v742_v25  ;;  %746 = vst.msk [vmem:[#allocation3] sm:$0xff] (%p823_p0), %vm26_vm0, %v742_v25 }
 0xd19   :  { %1087 = shalt.err (!%p1084_p9)
}
 0xd1a   :  { %s1088_s0 = scalar_lea.hbm %s1445_s5, 128 }
 0xd1b   :  { %p1089_p10 = scmp.ne.s32.totalorder %s1445_s5, %s1088_s0  ;;  %p1092_p11 = scmp.lt.u32.totalorder %s1088_s0, %s1445_s5 }
 0xd1d   :  { %p1094_p12 = pnand %p1092_p11, %p1089_p10 }
 0xd1f   :  { %1097 = shalt.err (!%p1094_p12)
}
 0xd20   :  { %759 = dma.vmem_to_hbm [thread:$0]  %s757_s22, 128, %s1445_s5, [#allocation4]  }
 0xd21   :  { %s1098_s1 = scalar_lea.vmem %s767_s24, 128  ;;  %p1103_p0 = scmp.lt.s32.totalorder %s767_s24, %s767_s24 }
 0xd22   :  { %p1099_p13 = scmp.ne.s32.totalorder %s767_s24, %s1098_s1  ;;  %p1104_p1 = scmp.lt.s32.totalorder %s1098_s1, %s1098_s1 }
 0xd24   :  { %p1105_p2 = por %p1104_p1, %p1103_p0 }
 0xd26   :  { %p1106_p3 = pnand %p1105_p2, %p1099_p13 }
 0xd28   :  { %1109 = shalt.err (!%p1106_p3)
}
 0xd29   :  { %s1110_s10 = scalar_lea.hbm %s1446_s6, 128 }
 0xd2a   :  { %p1111_p4 = scmp.ne.s32.totalorder %s1446_s6, %s1110_s10  ;;  %p1114_p5 = scmp.lt.u32.totalorder %s1110_s10, %s1446_s6 }
 0xd2c   :  { %p1116_p6 = pnand %p1114_p5, %p1111_p4 }
 0xd2e   :  { %1119 = shalt.err (!%p1116_p6)
}
 0xd2f   :  { %769 = dma.vmem_to_hbm [thread:$0]  %s767_s24, 128, %s1446_s6, [#allocation6]  }
 0xd30   :  { %1132 = dma.done.wait [#allocation4], 128  }
 0xd31   :  { %1133 = vsyncadd [#allocation4], 4294967168 }
 0xd32   :  { %1134 = dma.done.wait [#allocation6], 128  }
 0xd33   :  { %1135 = vsyncadd [#allocation6], 4294967168 }
 0xd34   :  { %778 = vsyncpa [#allocation4], 1 }
 0xd35   :  { %779 = vsyncpa [#allocation6], 1 }

// kernel: tpu_custom_call.1
= control target key start
LH: loop header
LB: loop body
LE: loop exit
PB: predicated region body
PF: predicated region fallthrough
CT: control target
= control target key end

     0   :  { %12 = vsyncpa [#allocation4], 0  ;;  %s1440_s0 = inlined_call_operand.vmem [shape: f32[64,32], index: 0, kind: input, shape index: {}]   ;;  %s1441_s1 = inlined_call_operand.vmem [shape: f32[32,128], index: 1, kind: input, shape index: {}]   ;;  %s1442_s2 = inlined_call_operand.vmem [shape: f32[32,128], index: 2, kind: input, shape index: {}]   ;;  %s1443_s3 = inlined_call_operand.vmem [shape: f32[1,128], index: 3, kind: input, shape index: {}]   ;;  %s1444_s4 = inlined_call_operand.vmem [shape: f32[64,32], index: 4, kind: output, shape index: {0}]   ;;  %s1445_s5 = inlined_call_operand.hbm [shape: f32[8,32], index: 5, kind: output, shape index: {1}]   ;;  %s1446_s6 = inlined_call_operand.hbm [shape: f32[8,32], index: 6, kind: output, shape index: {2}]  }
   0x1   :  { %13 = vsyncpa [#allocation6], 0  ;;  %v29_v0 = vld [vmem:[%s1441_s1] sm:$0xff]  ;;  %v30_v1 = vld [vmem:[%s1441_s1 + $0x8] sm:$0xff]  ;;  %vm26_vm0 = vcmask 261120   ;;  %v38_v2 = vlaneseq  ;;  %v1148_v6 = vmov 0.0  }
   0x2   :  { %v1199_v3 = vpack.c.bf16 %v30_v1, %v29_v0  ;;  %v31_v4 = vld [vmem:[%s1441_s1 + $0x10] sm:$0xff]  ;;  %v32_v5 = vld [vmem:[%s1441_s1 + $0x18] sm:$0xff]  ;;  %27 = vst.msk [vmem:[#allocation3] sm:$0xff] %vm26_vm0, %v1148_v6  ;;  %28 = vst.msk [vmem:[#allocation5] sm:$0xff] %vm26_vm0, %v1148_v6  ;;  %v1149_v15 = vmov 1.0  }
   0x3   :  { %v49_v7 = vld [vmem:[%s1440_s0] sm:$0xff]  ;;  %v1212_v8 = vpack.c.bf16 %v32_v5, %v31_v4  ;;  %v39_v9 = vand.u32 127, %v38_v2  ;;  %v51_v10 = vld [vmem:[%s1440_s0 + $0x10] sm:$0xff]  ;;  %v34_v12 = vld [vmem:[%s1442_s2 + $0x8] sm:$0xff] }
   0x4   :  { %906 = vmatprep.mubr.msk.f32.mxu0 %vm26_vm0, %v49_v7  ;;  %971 = vmatprep.subr.bf16.mxu0 %v1199_v3  ;;  %v33_v11 = vld [vmem:[%s1442_s2] sm:$0xff]  ;;  %v35_v13 = vld [vmem:[%s1442_s2 + $0x10] sm:$0xff]  ;;  %v36_v14 = vld [vmem:[%s1442_s2 + $0x18] sm:$0xff] }
   0x5   :  { %1010 = vmatprep.subr.bf16.mxu1 %v1199_v3  ;;  %973 = vmatpush3.bf16.msra.mxu0 %v1199_v3  ;;  %vm40_vm1 = vcmp.ge.s32.totalorder %v39_v9, 64  ;;  %vm41_vm2 = vcmp.lt.s32.totalorder %v39_v9, 96  ;;  %v50_v18 = vld [vmem:[%s1440_s0 + $0x8] sm:$0xff]  ;;  %v52_v25 = vld [vmem:[%s1440_s0 + $0x18] sm:$0xff]  ;;  %v1266_v26 = vld [vmem:[%s1443_s3] ss:$0 sm:$0xff] }
   0x6   :  { %1012 = vmatpush3.bf16.msra.mxu1 %v1199_v3  ;;  %975 = vmatprep.subr.bf16.mxu0 %v1212_v8  ;;  %vm42_vm3 = vmand %vm40_vm1, %vm41_vm2  ;;  %s1280_s3 = smov 0  }
   0x7   :  { %1011 = vmatprep.subr.bf16.mxu1 %v1212_v8  ;;  %909 = vmatprep.mubr.msk.f32.mxu1 %vm26_vm0, %v51_v10  ;;  %v1237_v16 = vsel %vm42_vm3, 2.0, %v1149_v15  ;;  %v1239_v17 = vsel %vm42_vm3, -1.0, %v1148_v6 }
   0x8   :  { %v1245_v19 = vmul.f32 %v1237_v16, %v33_v11  ;;  %v1248_v20 = vmul.f32 %v1237_v16, %v34_v12  ;;  %v1251_v21 = vmul.f32 %v1237_v16, %v35_v13  ;;  %v1254_v22 = vmul.f32 %v1237_v16, %v36_v14 }
   0x9   :  { %977 = vmatpush3.bf16.msra.mxu0 %v1212_v8  ;;  %v165_v23 = vld [vmem:[#allocation3] sm:$0xff]   ;;  %v166_v24 = vld [vmem:[#allocation5] sm:$0xff]  }
   0xa   :  { %1013 = vmatpush3.bf16.msra.mxu1 %v1212_v8 }
   0xc   :  { %907 = vmatmul.mubr.msk.f32.vlgmr.msra.gmra.mrb[0].mxu0 %vm26_vm0, %v50_v18 }
   0xd   :  { %910 = vmatmul.mubr.msk.f32.vlgmr.msra.gmra.mrb[0].mxu1 %vm26_vm0, %v52_v25 }
  0xdf   :  { %v908_v27 = vpop.f32.mrb[0].mxu0 }
  0xe0   :  { %v911_v28 = vpop.f32.mrb[0].mxu1  ;;  %v144_v29 = vadd.f32 %v908_v27, %v1266_v26  ;;  %v138_v31 = vpop.f32.mrb[1].mxu0 }
  0xe1   :  { %v154_v30 = vadd.f32 %v911_v28, %v1266_v26  ;;  %v148_v32 = vpop.f32.mrb[1].mxu1  ;;  %v139_v33 = vadd.f32 %v1266_v26, %v138_v31 }
  0xe2   :  { %v149_v34 = vadd.f32 %v1266_v26, %v148_v32  ;;  %v158_v35 = vmul.f32 %v144_v29, %v1237_v16 }
  0xe3   :  { %v160_v36 = vmul.f32 %v154_v30, %v1237_v16  ;;  %v157_v37 = vmul.f32 %v139_v33, %v1237_v16 }
  0xe4   :  { %v159_v38 = vmul.f32 %v149_v34, %v1237_v16  ;;  %162 = vst [vmem:[#allocation2 + $0x8] sm:$0xff] %v158_v35 }
  0xe5   :  { %164 = vst [vmem:[#allocation2 + $0x18] sm:$0xff] %v160_v36  ;;  %161 = vst [vmem:[#allocation2] sm:$0xff] %v157_v37 }
  0xe6   :  { %163 = vst [vmem:[#allocation2 + $0x10] sm:$0xff] %v159_v38 }
  0xe7 LB: > { %s1292_s21 = sadd.s32 1, %s1146_s3   ;;  %s1146_s3 = sphi %s1280_s3, %s1449_s3   ;;  %v1142_v23 = vphi %v165_v23, %v1448_v23   ;;  %v1138_v24 = vphi %v166_v24, %v1447_v24  }
  0xe8   : > { %p823_p0 = scmp.ge.s32.totalorder %s1292_s21, 2 }
  0xe9   : > { %979 = vmatprep.subr.bf16.mxu0 (!%p823_p0), %v1199_v3  ;;  %1014 = vmatprep.subr.bf16.mxu1 (!%p823_p0), %v1199_v3  ;;  %s828_s22 = sshll.u32 (!%p823_p0), %s1146_s3, 5  ;;  %s181_s26 = ssub.s32 (!%p823_p0), 0, %s1292_s21 }
  0xea   : > { %179 = sbr.rel (%p823_p0) target bundleno = 459 (0x1cb), region = 32  ;;  %981 = vmatpush3.bf16.msra.mxu0 (!%p823_p0), %v1199_v3  ;;  %1016 = vmatpush3.bf16.msra.mxu1 (!%p823_p0), %v1199_v3  ;;  %s781_s25 = scalar_lea.vmem (!%p823_p0), %s1440_s0, %s828_s22 }
  0xeb   : > { %983 = vmatprep.subr.bf16.mxu0 (!%p823_p0), %v1212_v8  ;;  %1015 = vmatprep.subr.bf16.mxu1 (!%p823_p0), %v1212_v8  ;;  %v829_v39 = vld [vmem:[%s781_s25 + $0x20] sm:$0xff] (!%p823_p0)  ;;  %v831_v40 = vld [vmem:[%s781_s25 + $0x30] sm:$0xff] (!%p823_p0)  ;;  %v830_v41 = vld [vmem:[%s781_s25 + $0x28] sm:$0xff] (!%p823_p0)  ;;  %s824_s27 = smin.u32 (!%p823_p0), %s181_s26, %s1292_s21  ;;  %p180_p1 = scmp.lt.s32.totalorder (!%p823_p0), %s1292_s21, 0 }
  0xec   : > { %920 = vmatprep.mubr.msk.f32.mxu0 (!%p823_p0), %vm26_vm0, %v829_v39  ;;  %923 = vmatprep.mubr.msk.f32.mxu1 (!%p823_p0), %vm26_vm0, %v831_v40  ;;  %v832_v42 = vld [vmem:[%s781_s25 + $0x38] sm:$0xff] (!%p823_p0)  ;;  %s183_s28 = sand.u32 (!%p823_p0), 1, %s824_s27  }
  0xed   : > { %s184_s29 = ssub.s32 (!%p823_p0), 0, %s183_s28 }
  0xee   : > { %985 = vmatpush3.bf16.msra.mxu0 (!%p823_p0), %v1212_v8  ;;  %1017 = vmatpush3.bf16.msra.mxu1 (!%p823_p0), %v1212_v8 }
  0xf1   : > { %921 = vmatmul.mubr.msk.f32.vlgmr.msra.gmra.mrb[0].mxu0 %vm26_vm0, %v830_v41  ;;  %924 = vmatmul.mubr.msk.f32.vlgmr.msra.gmra.mrb[0].mxu1 %vm26_vm0, %v832_v42  ;;  %s1451_s29 = smov (!%p180_p1, %s184_s29), %s183_s28 }
  0xf2   : > { %p826_p2 = scmp.lt.s32.totalorder %s1451_s29, 0  ;;  %s190_s30 = sadd.s32 2, %s1451_s29 }
  0xf4   : > { %s1453_s30 = smov (!%p826_p2, %s190_s30), %s1451_s29 }
  0xf5   : > { %s827_s7 = sshll.u32 %s1453_s30, 5 }
  0xf6   : > { %s300_s1 = scalar_lea.vmem [#allocation2], %s827_s7 }
 0x1c4   : > { %v922_v43 = vpop.f32.mrb[0].mxu0  ;;  %v925_v44 = vpop.f32.mrb[0].mxu1 }
 0x1c5   : > { %v283_v45 = vadd.f32 %v922_v43, %v1266_v26  ;;  %v293_v46 = vadd.f32 %v925_v44, %v1266_v26  ;;  %v277_v47 = vpop.f32.mrb[1].mxu0  ;;  %v287_v48 = vpop.f32.mrb[1].mxu1 }
 0x1c6   : > { %v278_v49 = vadd.f32 %v1266_v26, %v277_v47  ;;  %v288_v50 = vadd.f32 %v1266_v26, %v287_v48 }
 0x1c7   : > { %v297_v51 = vmul.f32 %v283_v45, %v1237_v16  ;;  %v299_v52 = vmul.f32 %v293_v46, %v1237_v16 }
 0x1c8   : > { %v296_v53 = vmul.f32 %v278_v49, %v1237_v16  ;;  %v298_v54 = vmul.f32 %v288_v50, %v1237_v16 }
 0x1c9   : > { %302 = vst [vmem:[%s300_s1 + $0x8] sm:$0xff] %v297_v51  ;;  %304 = vst [vmem:[%s300_s1 + $0x18] sm:$0xff] %v299_v52 }
 0x1ca   : > { %301 = vst [vmem:[%s300_s1] sm:$0xff] %v296_v53  ;;  %303 = vst [vmem:[%s300_s1 + $0x10] sm:$0xff] %v298_v54 }
 0x1cb PF: > { %v1326_v55 = vpack.c.bf16 %v1248_v20, %v1245_v19  ;;  %v1150_v56 = vmov 0.0|0.0   ;;  %v1333_v57 = vpack.c.bf16 %v1254_v22, %v1251_v21  ;;  %vm1151_vm4 = vmmov 0   ;;  %s306_s8 = ssub.s32 0, %s1146_s3  ;;  %p305_p3 = scmp.lt.s32.totalorder %s1146_s3, 0 }
 0x1cc   : > { %986 = vmatprep.subr.bf16.mxu0 %v1150_v56  ;;  %992 = vmatprep.subr.bf16.mxu1 %v1150_v56  ;;  %v1152_v58 = vmov 0.0   ;;  %s837_s9 = smin.u32 %s1146_s3, %s306_s8  ;;  %s1153_s15 = smov 32  }
 0x1cd   : > { %988 = vmatpush3.bf16.msra.mxu0 %v1326_v55  ;;  %934 = vmatprep.mubr.msk.f32.mxu0 %vm1151_vm4, %v1152_v58  ;;  %s308_s10 = sand.u32 1, %s837_s9   ;;  %s1154_s16 = smov 64  }
 0x1ce   : > { %989 = vmatprep.subr.bf16.mxu0 %v1150_v56  ;;  %994 = vmatpush3.bf16.msra.mxu1 %v1326_v55  ;;  %s309_s11 = ssub.s32 0, %s308_s10  ;;  %s1155_s17 = smov 96  }
 0x1cf   : > { %995 = vmatprep.subr.bf16.mxu1 %v1150_v56  ;;  %945 = vmatprep.mubr.msk.f32.mxu1 %vm1151_vm4, %v1152_v58  ;;  %s1455_s11 = smov (!%p305_p3, %s309_s11), %s308_s10  ;;  %s841_s2 = sshll.u32 %s1146_s3, 5 }
 0x1d0   : > { %p839_p4 = scmp.lt.s32.totalorder %s1455_s11, 0  ;;  %s315_s12 = sadd.s32 2, %s1455_s11 }
 0x1d1   : > { %991 = vmatpush3.bf16.msra.mxu0 %v1333_v57  ;;  %s1367_s20 = scalar_lea.vmem %s1444_s4, %s841_s2  ;;  %s1449_s3 = smov %s1292_s21 }
 0x1d2   : > { %997 = vmatpush3.bf16.msra.mxu1 %v1333_v57  ;;  %998 = vmatprep.subr.bf16.mxu0 %v1150_v56  ;;  %s1457_s12 = smov (!%p839_p4, %s315_s12), %s1455_s11  ;;  %s1156_s3 = smov (%p823_p0), [#allocation3]  }
 0x1d3   : > { %1004 = vmatprep.subr.bf16.mxu1 %v1150_v56  ;;  %s840_s13 = sshll.u32 %s1457_s12, 5  ;;  %s756_s22 = sshll.u32 (%p823_p0), %s1156_s3, 4  ;;  %s757_s22 = int_to_ptr.vmem [resolvable:$true] %s756_s22 }
 0x1d4   : > { %935 = vmatmul.mubr.msk.f32.vlgmr.msra.gmra.mrb[0].mxu0 %vm26_vm0, %v1142_v23  ;;  %s1353_s14 = scalar_lea.vmem [#allocation2], %s840_s13  ;;  %s1157_s23 = smov (%p823_p0), [#allocation5]  }
 0x1d5   : > { %1000 = vmatpush3.bf16.msra.mxu0 %v1326_v55  ;;  %956 = vmatprep.mubr.msk.f32.mxu0 %vm1151_vm4, %v1152_v58  ;;  %v320_v59 = vld [vmem:[%s1353_s14] sm:$0xff]  ;;  %v845_v18 = vld [vmem:[%s1353_s14 + $0x8] sm:$0xff]  ;;  %v851_v42 = vld [vmem:[%s1353_s14 + $0x10] sm:$0xff]  ;;  %s766_s24 = sshll.u32 (%p823_p0), %s1157_s23, 4  ;;  %s1076_s25 = scalar_lea.vmem (%p823_p0), %s757_s22, 128  ;;  %s767_s24 = int_to_ptr.vmem [resolvable:$true] %s766_s24 }
 0x1d6   : > { %1001 = vmatprep.subr.bf16.mxu0 %v1150_v56  ;;  %p1077_p5 = scmp.ne.s32.totalorder (%p823_p0), %s757_s22, %s1076_s25  ;;  %p1081_p6 = scmp.lt.s32.totalorder (%p823_p0), %s757_s22, %s757_s22 }
 0x1d7   :  { %p1082_p7 = scmp.lt.s32.totalorder (%p823_p0), %s1076_s25, %s1076_s25 }
 0x1d9   : > { %1003 = vmatpush3.bf16.msra.mxu0 %v1333_v57  ;;  %p1083_p8 = por (%p823_p0), %p1082_p7, %p1081_p6 }
 0x1db   :  { %p1084_p9 = pnand (%p823_p0), %p1083_p8, %p1077_p5 }
 0x2a7   : > { %v390_v60 = vpop.f32.mrb[0].mxu0 }
 0x2a8   : > { %v391_v61 = vadd.f32 %v390_v60, %v320_v59  ;;  %v936_v62 = vpop.f32.mrb[1].mxu0 }
 0x2aa   : > { %v843_v63 = vmul.f32 -1.442695, %v391_v61  ;;  %v857_v61 = vld [vmem:[%s1353_s14 + $0x18] sm:$0xff] }
 0x2ac   : > { %1052 = vpow2.f32 %v843_v63 }
 0x2b6   : > { %v1053_v0 = vpop.eup %1052 }
 0x2b7   : > { %v397_v1 = vadd.f32 1.0, %v1053_v0 }
 0x2b9   : > { %1054 = vrcp.f32 %v397_v1 }
 0x2c3   : > { %v1055_v2 = vpop.eup %1054 }
 0x2c4   : > { %v400_v4 = vmul.f32 %v1055_v2, %v1237_v16 }
 0x2c6   : > { %v401_v5 = vadd.f32 %v400_v4, %v1239_v17 }
 0x2c8   : > { %404 = vrot.lane.b32.xlu0 %v401_v5, %s1153_s15  ;;  %v402_v9 = vmul.f32 %v1138_v24, %v401_v5 }
 0x33a   : > { %v405_v6 = vpop.permute.xlu0 %404 }
 0x33b   : > { %v407_v7 = vmul.f32 %v405_v6, %v401_v5 }
 0x33d   : > { %409 = vrot.lane.b32.xlu0 %v407_v7, %s1154_s16 }
 0x3af   : > { %v410_v10 = vpop.permute.xlu0 %409 }
 0x3b0   : > { %v412_v11 = vadd.f32 %v410_v10, %v402_v9 }
 0x3b2   : > { %1056 = vtanh.f32 %v412_v11 }
 0x3bc   : > { %v1057_v12 = vpop.eup %1056 }
 0x3bd   : > { %415 = vrot.lane.b32.xlu1 %v1057_v12, %s1155_s17 }
 0x42f   : > { %v416_v13 = vpop.permute.xlu1 %415 }
 0x430   : > { %v418_v14 = vmul.f32 %v416_v13, %v401_v5 }
 0x432   : > { %420 = vrot.lane.b32.xlu1 %v418_v14, %s1153_s15 }
 0x4a4   : > { %v421_v15 = vpop.permute.xlu1 %420 }
 0x4a5   : > { %424 = vst.msk [vmem:[%s1367_s20] sm:$0xff] %vm26_vm0, %v421_v15  ;;  %946 = vmatmul.mubr.msk.f32.vlgmr.msra.gmra.mrb[0].mxu1 %vm26_vm0, %v421_v15 }
 0x4a6   : > { %1006 = vmatpush3.bf16.msra.mxu1 %v1326_v55  ;;  %967 = vmatprep.mubr.msk.f32.mxu1 %vm1151_vm4, %v1152_v58 }
 0x4a7   : > { %1007 = vmatprep.subr.bf16.mxu1 %v1150_v56 }
 0x4aa   : > { %1009 = vmatpush3.bf16.msra.mxu1 %v1333_v57 }
 0x578   : > { %v497_v23 = vpop.f32.mrb[0].mxu1 }
 0x579   : > { %v498_v24 = vadd.f32 %v845_v18, %v497_v23  ;;  %v947_v25 = vpop.f32.mrb[1].mxu1 }
 0x57b   : > { %v847_v27 = vmul.f32 -1.442695, %v498_v24 }
 0x57d   : > { %1058 = vpow2.f32 %v847_v27 }
 0x587   : > { %v1059_v28 = vpop.eup %1058 }
 0x588   : > { %v504_v29 = vadd.f32 1.0, %v1059_v28 }
 0x58a   : > { %1060 = vrcp.f32 %v504_v29 }
 0x594   : > { %v1061_v30 = vpop.eup %1060 }
 0x595   : > { %v507_v31 = vmul.f32 %v1061_v30, %v1237_v16 }
 0x597   : > { %v508_v32 = vadd.f32 %v507_v31, %v1239_v17 }
 0x599   : > { %511 = vrot.lane.b32.xlu0 %v508_v32, %s1153_s15  ;;  %v509_v35 = vmul.f32 %v508_v32, %v412_v11 }
 0x60b   : > { %v512_v33 = vpop.permute.xlu0 %511 }
 0x60c   : > { %v514_v34 = vmul.f32 %v512_v33, %v508_v32 }
 0x60e   : > { %516 = vrot.lane.b32.xlu1 %v514_v34, %s1154_s16 }
 0x680   : > { %v517_v36 = vpop.permute.xlu1 %516 }
 0x681   : > { %v519_v37 = vadd.f32 %v517_v36, %v509_v35 }
 0x683   : > { %1062 = vtanh.f32 %v519_v37 }
 0x68d   : > { %v1063_v38 = vpop.eup %1062 }
 0x68e   : > { %522 = vrot.lane.b32.xlu0 %v1063_v38, %s1155_s17 }
 0x700   : > { %v523_v39 = vpop.permute.xlu0 %522 }
 0x701   : > { %v525_v40 = vmul.f32 %v523_v39, %v508_v32 }
 0x703   : > { %527 = vrot.lane.b32.xlu1 %v525_v40, %s1153_s15 }
 0x775   : > { %v528_v41 = vpop.permute.xlu1 %527 }
 0x776   : > { %849 = vst.msk [vmem:[%s1367_s20 + $0x8] sm:$0xff] %vm26_vm0, %v528_v41  ;;  %957 = vmatmul.mubr.msk.f32.vlgmr.msra.gmra.mrb[2].mxu0 %vm26_vm0, %v528_v41 }
 0x849   : > { %v604_v43 = vpop.f32.mrb[2].mxu0 }
 0x84a   : > { %v605_v44 = vadd.f32 %v851_v42, %v604_v43  ;;  %v958_v45 = vpop.f32.mrb[3].mxu0 }
 0x84c   : > { %v853_v46 = vmul.f32 -1.442695, %v605_v44 }
 0x84e   : > { %1064 = vpow2.f32 %v853_v46 }
 0x858   : > { %v1065_v47 = vpop.eup %1064 }
 0x859   : > { %v611_v48 = vadd.f32 1.0, %v1065_v47 }
 0x85b   : > { %1066 = vrcp.f32 %v611_v48 }
 0x865   : > { %v1067_v49 = vpop.eup %1066 }
 0x866   : > { %v614_v50 = vmul.f32 %v1067_v49, %v1237_v16 }
 0x868   : > { %v615_v51 = vadd.f32 %v614_v50, %v1239_v17 }
 0x86a   : > { %618 = vrot.lane.b32.xlu0 %v615_v51, %s1153_s15  ;;  %v616_v54 = vmul.f32 %v615_v51, %v519_v37 }
 0x8dc   : > { %v619_v52 = vpop.permute.xlu0 %618 }
 0x8dd   : > { %v621_v53 = vmul.f32 %v619_v52, %v615_v51 }
 0x8df   : > { %623 = vrot.lane.b32.xlu1 %v621_v53, %s1154_s16 }
 0x951   : > { %v624_v55 = vpop.permute.xlu1 %623 }
 0x952   : > { %v626_v56 = vadd.f32 %v624_v55, %v616_v54 }
 0x954   : > { %1068 = vtanh.f32 %v626_v56 }
 0x95e   : > { %v1069_v57 = vpop.eup %1068 }
 0x95f   : > { %629 = vrot.lane.b32.xlu0 %v1069_v57, %s1155_s17 }
 0x9d1   : > { %v630_v58 = vpop.permute.xlu0 %629 }
 0x9d2   : > { %v632_v59 = vmul.f32 %v630_v58, %v615_v51 }
 0x9d4   : > { %634 = vrot.lane.b32.xlu1 %v632_v59, %s1153_s15 }
 0xa46   : > { %v635_v60 = vpop.permute.xlu1 %634 }
 0xa47   : > { %855 = vst.msk [vmem:[%s1367_s20 + $0x10] sm:$0xff] %vm26_vm0, %v635_v60  ;;  %968 = vmatmul.mubr.msk.f32.vlgmr.msra.gmra.mrb[2].mxu1 %vm26_vm0, %v635_v60 }
 0xb1a   : > { %v711_v62 = vpop.f32.mrb[2].mxu1 }
 0xb1b   : > { %v712_v63 = vadd.f32 %v857_v61, %v711_v62  ;;  %v969_v0 = vpop.f32.mrb[3].mxu1 }
 0xb1d   : > { %v859_v1 = vmul.f32 -1.442695, %v712_v63 }
 0xb1f   : > { %1070 = vpow2.f32 %v859_v1 }
 0xb29   : > { %v1071_v2 = vpop.eup %1070 }
 0xb2a   : > { %v718_v4 = vadd.f32 1.0, %v1071_v2 }
 0xb2c   : > { %1072 = vrcp.f32 %v718_v4 }
 0xb36   : > { %v1073_v5 = vpop.eup %1072 }
 0xb37   : > { %v721_v6 = vmul.f32 %v1073_v5, %v1237_v16 }
 0xb39   : > { %v722_v7 = vadd.f32 %v721_v6, %v1239_v17 }
 0xb3b   : > { %725 = vrot.lane.b32.xlu0 %v722_v7, %s1153_s15  ;;  %v723_v11 = vmul.f32 %v722_v7, %v626_v56 }
 0xbad   : > { %v726_v9 = vpop.permute.xlu0 %725 }
 0xbae   : > { %v728_v10 = vmul.f32 %v726_v9, %v722_v7 }
 0xbb0   : > { %730 = vrot.lane.b32.xlu1 %v728_v10, %s1154_s16 }
 0xc22   : > { %v731_v12 = vpop.permute.xlu1 %730 }
 0xc23   : > { %v733_v13 = vadd.f32 %v731_v12, %v723_v11  }
 0xc25   : > { %1074 = vtanh.f32 %v733_v13  ;;  %v1447_v24 = vmov %v733_v13  ;;  %747 = vst.msk [vmem:[#allocation5] sm:$0xff] (%p823_p0), %vm26_vm0, %v733_v13 }
 0xc2f   : > { %v1075_v14 = vpop.eup %1074 }
 0xc30   : > { %736 = vrot.lane.b32.xlu0 %v1075_v14, %s1155_s17 }
 0xca2   : > { %v737_v15 = vpop.permute.xlu0 %736 }
 0xca3   : > { %v739_v18 = vmul.f32 %v737_v15, %v722_v7 }
 0xca5   : > { %741 = vrot.lane.b32.xlu1 %v739_v18, %s1153_s15 }
 0xd12   :  { %171 = sbr.rel (!%p823_p0) target bundleno = 231 (0xe7), region = 77 }
 0xd17   : > { %v742_v25 = vpop.permute.xlu1 %741  }
 0xd18   : > { %861 = vst.msk [vmem:[%s1367_s20 + $0x18] sm:$0xff] %vm26_vm0, %v742_v25  ;;  %v1448_v23 = vmov %v742_v25  ;;  %746 = vst.msk [vmem:[#allocation3] sm:$0xff] (%p823_p0), %vm26_vm0, %v742_v25 }
 0xd19   :  { %1087 = shalt.err (!%p1084_p9)
}
 0xd1a   :  { %s1088_s0 = scalar_lea.hbm %s1445_s5, 128 }
 0xd1b   :  { %p1089_p10 = scmp.ne.s32.totalorder %s1445_s5, %s1088_s0  ;;  %p1092_p11 = scmp.lt.u32.totalorder %s1088_s0, %s1445_s5 }
 0xd1d   :  { %p1094_p12 = pnand %p1092_p11, %p1089_p10 }
 0xd1f   :  { %1097 = shalt.err (!%p1094_p12)
}
 0xd20   :  { %759 = dma.vmem_to_hbm [thread:$0]  %s757_s22, 128, %s1445_s5, [#allocation4]  }
 0xd21   :  { %s1098_s1 = scalar_lea.vmem %s767_s24, 128  ;;  %p1103_p0 = scmp.lt.s32.totalorder %s767_s24, %s767_s24 }
 0xd22   :  { %p1099_p13 = scmp.ne.s32.totalorder %s767_s24, %s1098_s1  ;;  %p1104_p1 = scmp.lt.s32.totalorder %s1098_s1, %s1098_s1 }
 0xd24   :  { %p1105_p2 = por %p1104_p1, %p1103_p0 }
 0xd26   :  { %p1106_p3 = pnand %p1105_p2, %p1099_p13 }
 0xd28   :  { %1109 = shalt.err (!%p1106_p3)
}
 0xd29   :  { %s1110_s10 = scalar_lea.hbm %s1446_s6, 128 }
 0xd2a   :  { %p1111_p4 = scmp.ne.s32.totalorder %s1446_s6, %s1110_s10  ;;  %p1114_p5 = scmp.lt.u32.totalorder %s1110_s10, %s1446_s6 }
 0xd2c   :  { %p1116_p6 = pnand %p1114_p5, %p1111_p4 }
 0xd2e   :  { %1119 = shalt.err (!%p1116_p6)
}
 0xd2f   :  { %769 = dma.vmem_to_hbm [thread:$0]  %s767_s24, 128, %s1446_s6, [#allocation6]  }
 0xd30   :  { %1132 = dma.done.wait [#allocation4], 128  }
 0xd31   :  { %1133 = vsyncadd [#allocation4], 4294967168 }
 0xd32   :  { %1134 = dma.done.wait [#allocation6], 128  }
 0xd33   :  { %1135 = vsyncadd [#allocation6], 4294967168 }
 0xd34   :  { %778 = vsyncpa [#allocation4], 1 }
 0xd35   :  { %779 = vsyncpa [#allocation6], 1 }

</bundles_post_ra>
